<compile_context>
chip_gen: v7x
topology: tpu7x:2x2x1
jax: 0.10.0
libtpu: 0.0.40
codegen_flags: <defaults>
</compile_context>

<pallas_src>
import jax
import jax.numpy as jnp
from jax import lax
from jax.experimental import pallas as pl
from jax.experimental.pallas import tpu as pltpu

BN_EPS = 1e-5
LANE = 128


def _vmem_capacity_bytes():
    try:
        return int(pltpu.get_tpu_info().vmem_capacity_bytes)
    except Exception:
        return 128 << 20          # v5e/v6e fallback; v7x reports 64 MiB


def _vmem_limit_bytes():
    # ~3/4 of physical VMEM: 96 MiB on v5e/v6e, 48 MiB on v7x.
    return int((_vmem_capacity_bytes() * 3) // 4)


def _estimate_tile_vmem(TH, W, Cin, Cout, Cp, compute_dtype):
    """Per-step VMEM bytes for a TH-row tile, counting every buffer."""
    Wp = W + 2
    ib = jnp.dtype(compute_dtype).itemsize    # operand / intermediate bytes
    dbuf = 2                                  # Pallas double-buffers each block
    x_main = dbuf * TH * Wp * Cin * ib
    x_halo = dbuf * 2 * Wp * Cin * ib
    weights = dbuf * 9 * Cin * Cp * ib
    conv_out = dbuf * TH * W * Cout * ib
    stats = dbuf * 2 * 8 * Cp * 4
    # In-kernel temporaries: concat window, 9*Cin im2col patches, f32 acc
    # (x2 for the sum-of-squares term).
    xw = (TH + 2) * Wp * Cin * ib
    patches = TH * W * 9 * Cin * ib
    acc = 2 * TH * W * Cp * 4
    return x_main + x_halo + weights + conv_out + stats + xw + patches + acc


def _choose_row_block(H, W, Cin, Cout, Cp, compute_dtype):
    """Largest divisor of H whose full per-step working set stays well under
    the generation-dependent VMEM limit; prefer TH*W multiples of 256 so the
    MXU M-dimension fills the 256-wide MXU on v6e/v7x."""
    budget = int(_vmem_limit_bytes() * 0.6)   # ~40% headroom under the limit
    best, best_aligned = 1, None
    for th in range(1, H + 1):
        if H % th:
            continue
        if _estimate_tile_vmem(th, W, Cin, Cout, Cp, compute_dtype) > budget:
            continue
        best = th
        if (th * W) % 256 == 0:
            best_aligned = th
    return best_aligned if best_aligned is not None else best


# ---------------------------------------------------------------------------
# Pass 1: conv3x3 (stride 1, pad 1) + per-batch per-channel sum / sum-of-sq.
# ---------------------------------------------------------------------------
def _conv_stats_kernel(xm_ref, xh0_ref, xh1_ref, w_ref,
                       conv_ref, sum_ref, sumsq_ref):
    # xm_ref:   (1, TH, Wp, Cin)   main padded-input rows of this tile
    # xh0/xh1:  (1, 1,  Wp, Cin)   the two halo rows below the main rows
    # w_ref:    (9*Cin, Cp)        HWIO weights, Cout lane-padded to Cp
    # conv_ref: (1, TH, W, Cout)   conv tile (compute dtype), true channels only
    # sum_ref / sumsq_ref: (1, 8, Cp) per-batch f32 accumulators, resident
    #                                 across the row-block (reduction) axis
    _, TH, W, Cout = conv_ref.shape
    Cin = xm_ref.shape[-1]

    @pl.when(pl.program_id(1) == 0)
    def _init():
        sum_ref[...] = jnp.zeros_like(sum_ref)
        sumsq_ref[...] = jnp.zeros_like(sumsq_ref)

    # (TH+2, Wp, Cin) input window for this row block.
    xw = jnp.concatenate([xm_ref[...], xh0_ref[...], xh1_ref[...]], axis=1)[0]

    # im2col: one K = 9*Cin MXU contraction per tile (not 9 skinny matmuls).
    # TODO(synk): with Cin << 128 the lane-axis concat is XLU/VPU shuffle work;
    # a W-in-lanes layout (or padding Cin to 128) would avoid it.
    cols = []
    for kh in range(3):
        for kw in range(3):
            cols.append(xw[kh:kh + TH, kw:kw + W, :])
    patches = jnp.concatenate(cols, axis=-1).reshape(TH * W, 9 * Cin)

    acc = jnp.dot(patches, w_ref[...],
                  preferred_element_type=jnp.float32)          # (TH*W, Cp) f32

    # BN statistics from the f32 accumulator, before any down-cast.
    sum_ref[...] += jnp.sum(acc, axis=0, keepdims=True)
    sumsq_ref[...] += jnp.sum(acc * acc, axis=0, keepdims=True)

    # Only the true Cout channels go back to HBM, in the compute dtype.
    conv_ref[...] = acc[:, :Cout].reshape(1, TH, W, Cout).astype(conv_ref.dtype)


# ---------------------------------------------------------------------------
# Pass 2: fused  y = max(conv * scale + bias, 0)  (f32 math, narrow storage).
# ---------------------------------------------------------------------------
def _bn_relu_kernel(y_ref, scale_ref, bias_ref, out_ref):
    y = y_ref[...].astype(jnp.float32)
    out_ref[...] = jnp.maximum(y * scale_ref[...] + bias_ref[...],
                               0.0).astype(out_ref.dtype)


def basic_block_forward(x_nchw, w_oihw, gamma, beta, stride=1,
                        row_block=None, compute_dtype=jnp.bfloat16):
    """NCHW in / NCHW out, matching PyTorch BasicBlock.forward (stride=1)."""
    # TODO(synk): stride > 1 is not implemented (this module's forward with its
    # default constructor is conv3x3(stride=1) + BN + ReLU, no residual add).
    assert stride == 1, "only stride=1 implemented"
    N, Cin, H, W = x_nchw.shape
    Cout = w_oihw.shape[0]
    Cp = ((Cout + LANE - 1) // LANE) * LANE        # lane-dense MXU N-dim pad
    Wp = W + 2

    if row_block is None:
        row_block = _choose_row_block(H, W, Cin, Cout, Cp, compute_dtype)
    TH = int(row_block)
    assert H % TH == 0, "row_block must divide H"

    # TODO(synk): keep activations NHWC (and pre-padded) end-to-end between
    # blocks so these transposes / the pad become one-time costs.
    x_nhwc = jnp.transpose(x_nchw, (0, 2, 3, 1)).astype(compute_dtype)
    x_pad = jnp.pad(x_nhwc, ((0, 0), (1, 1), (1, 1), (0, 0)))

    w_hwio = jnp.transpose(w_oihw, (2, 3, 1, 0)).astype(jnp.float32)
    w_hwio = jnp.pad(w_hwio, ((0, 0), (0, 0), (0, 0), (0, Cp - Cout)))
    w2d = w_hwio.reshape(9 * Cin, Cp).astype(compute_dtype)

    grid = (N, H // TH)
    vmem = _vmem_limit_bytes()

    conv_raw, psum, psumsq = pl.pallas_call(
        _conv_stats_kernel,
        grid=grid,
        in_specs=[
            pl.BlockSpec((1, TH, Wp, Cin), lambda nb, r: (nb, r, 0, 0)),
            pl.BlockSpec((1, 1, Wp, Cin), lambda nb, r: (nb, r * TH + TH, 0, 0)),
            pl.BlockSpec((1, 1, Wp, Cin), lambda nb, r: (nb, r * TH + TH + 1, 0, 0)),
            pl.BlockSpec((9 * Cin, Cp), lambda nb, r: (0, 0)),
        ],
        out_specs=[
            pl.BlockSpec((1, TH, W, Cout), lambda nb, r: (nb, r, 0, 0)),
            pl.BlockSpec((1, 8, Cp), lambda nb, r: (nb, 0, 0)),
            pl.BlockSpec((1, 8, Cp), lambda nb, r: (nb, 0, 0)),
        ],
        out_shape=(
            jax.ShapeDtypeStruct((N, H, W, Cout), compute_dtype),
            jax.ShapeDtypeStruct((N, 8, Cp), jnp.float32),
            jax.ShapeDtypeStruct((N, 8, Cp), jnp.float32),
        ),
        compiler_params=pltpu.CompilerParams(
            # Per-batch stat partials -> batch axis has no cross-core conflict
            # (uses both v7x TCs); the row axis carries the accumulation.
            dimension_semantics=("parallel", "arbitrary"),
            vmem_limit_bytes=vmem,
        ),
    )(x_pad, x_pad, x_pad, w2d)

    # Tiny per-channel math on true channels only: batch-stat BN -> scale/bias.
    m = jnp.float32(N * H * W)
    ch_sum = psum[:, 0, :Cout].sum(axis=0)
    ch_sumsq = psumsq[:, 0, :Cout].sum(axis=0)
    mean = ch_sum / m
    # TODO(synk): for very large N*H*W switch to mean-centered per-tile
    # partials (Welford merge) instead of E[x^2] - E[x]^2.
    var = jnp.maximum(ch_sumsq / m - mean * mean, 0.0)      # biased variance
    inv_std = lax.rsqrt(var + BN_EPS)
    g32 = gamma.astype(jnp.float32)
    scale = (g32 * inv_std).reshape(1, Cout)
    bias = (beta.astype(jnp.float32) - mean * g32 * inv_std).reshape(1, Cout)
    # TODO(synk): running_mean / running_var updates (PyTorch training-time
    # side effect) are not produced; only the forward activation is returned.

    out_nhwc = pl.pallas_call(
        _bn_relu_kernel,
        grid=grid,
        in_specs=[
            pl.BlockSpec((1, TH, W, Cout), lambda nb, r: (nb, r, 0, 0)),
            pl.BlockSpec((1, Cout), lambda nb, r: (0, 0)),
            pl.BlockSpec((1, Cout), lambda nb, r: (0, 0)),
        ],
        out_specs=pl.BlockSpec((1, TH, W, Cout), lambda nb, r: (nb, r, 0, 0)),
        out_shape=jax.ShapeDtypeStruct((N, H, W, Cout), jnp.float32),
        compiler_params=pltpu.CompilerParams(
            dimension_semantics=("parallel", "parallel"),
            vmem_limit_bytes=vmem,
        ),
    )(conv_raw, scale, bias)

    return jnp.transpose(out_nhwc, (0, 3, 1, 2))


def _reference(x_nchw, w_oihw, gamma, beta):
    """Pure-JAX reference (NCHW conv + train-mode BN + ReLU) for validation."""
    conv = lax.conv_general_dilated(
        x_nchw.astype(jnp.float32), w_oihw.astype(jnp.float32),
        window_strides=(1, 1), padding=((1, 1), (1, 1)),
        dimension_numbers=("NCHW", "OIHW", "NCHW"))
    mean = jnp.mean(conv, axis=(0, 2, 3), keepdims=True)
    var = jnp.mean((conv - mean) ** 2, axis=(0, 2, 3), keepdims=True)
    y = (conv - mean) * lax.rsqrt(var + BN_EPS)
    y = y * gamma.reshape(1, -1, 1, 1) + beta.reshape(1, -1, 1, 1)
    return jnp.maximum(y, 0.0)


if __name__ == "__main__":
    # Small shapes consistent with BasicBlock(in_planes=4, planes=8, stride=1).
    N, Cin, H, W = 2, 4, 16, 16
    Cout = 8

    key = jax.random.PRNGKey(0)
    kx, kw = jax.random.split(key)
    x = jax.random.normal(kx, (N, Cin, H, W), dtype=jnp.float32)
    w = 0.1 * jax.random.normal(kw, (Cout, Cin, 3, 3), dtype=jnp.float32)
    gamma = jnp.ones((Cout,), dtype=jnp.float32)   # BatchNorm2d default affine
    beta = jnp.zeros((Cout,), dtype=jnp.float32)

    ref = jax.block_until_ready(_reference(x, w, gamma, beta))

    # Strict f32 path with explicit row tiling (exercises the halo blocks and
    # the per-batch stat accumulation across row steps).
    out_f32 = jax.block_until_ready(
        basic_block_forward(x, w, gamma, beta, row_block=8,
                            compute_dtype=jnp.float32))
    assert out_f32.shape == (N, Cout, H, W)
    assert jnp.allclose(out_f32, ref, atol=2e-4, rtol=2e-4)

    # Default fast path: bf16 MXU operands + bf16 conv intermediate, auto tile
    # (picks a TH with TH*W a multiple of 256 here).
    out = jax.block_until_ready(basic_block_forward(x, w, gamma, beta))
    assert out.shape == (N, Cout, H, W)
    assert bool(jnp.all(jnp.isfinite(out)))
    assert jnp.allclose(out, ref, atol=5e-2, rtol=5e-2)

    print("KERNEL_OK")
</pallas_src>

<mosaic_0001>
module attributes {stable_mosaic.version = 11 : i64} {
  func.func @_conv_stats_kernel(%arg0: i32, %arg1: i32, %arg2: memref<1x8x18x4xf32, #tpu.memory_space<vmem>>, %arg3: memref<1x1x18x4xf32, #tpu.memory_space<vmem>>, %arg4: memref<1x1x18x4xf32, #tpu.memory_space<vmem>>, %arg5: memref<36x128xf32, #tpu.memory_space<vmem>>, %arg6: memref<1x8x16x8xf32, #tpu.memory_space<vmem>>, %arg7: memref<1x8x128xf32, #tpu.memory_space<vmem>>, %arg8: memref<1x8x128xf32, #tpu.memory_space<vmem>>) attributes {dimension_semantics = [#tpu.dimension_semantics<parallel>, #tpu.dimension_semantics<arbitrary>], iteration_bounds = array<i64: 2, 2>, scalar_prefetch = 0 : i64, scratch_operands = 0 : i64, tpu.core_type = #tpu.core_type<tc>, window_params = [{transform_indices = @transform_0, window_bounds = array<i64: 1, 8, 18, 4>}, {transform_indices = @transform_1, window_bounds = array<i64: 1, 1, 18, 4>}, {transform_indices = @transform_2, window_bounds = array<i64: 1, 1, 18, 4>}, {pipeline_mode = #tpu.pipeline_mode<synchronous>, transform_indices = @transform_3, window_bounds = array<i64: 36, 128>}, {transform_indices = @transform_4, window_bounds = array<i64: 1, 8, 16, 8>}, {transform_indices = @transform_5, window_bounds = array<i64: 1, 8, 128>}, {transform_indices = @transform_6, window_bounds = array<i64: 1, 8, 128>}]} {
    %c0_i32 = arith.constant 0 : i32
    %0 = arith.cmpi eq, %arg1, %c0_i32 : i32
    %1 = arith.extui %0 : i1 to i32
    %c0_i32_0 = arith.constant 0 : i32
    %2 = arith.cmpi ne, %1, %c0_i32_0 : i32
    scf.if %2 {
      %cst_32 = arith.constant 0.000000e+00 : f32
      %39 = vector.broadcast %cst_32 : f32 to vector<1x8x128xf32>
      %c0_33 = arith.constant 0 : index
      %c0_34 = arith.constant 0 : index
      %c0_35 = arith.constant 0 : index
      %40 = vector.load %arg7[%c0_33, %c0_34, %c0_35] : memref<1x8x128xf32, #tpu.memory_space<vmem>>, vector<1x8x128xf32>
      tpu.vector_store %arg7[%c0_33, %c0_34, %c0_35], %39 {strides = array<i32>} : memref<1x8x128xf32, #tpu.memory_space<vmem>>, vector<1x8x128xf32>,
      %cst_36 = arith.constant 0.000000e+00 : f32
      %41 = vector.broadcast %cst_36 : f32 to vector<1x8x128xf32>
      %c0_37 = arith.constant 0 : index
      %c0_38 = arith.constant 0 : index
      %c0_39 = arith.constant 0 : index
      %42 = vector.load %arg8[%c0_37, %c0_38, %c0_39] : memref<1x8x128xf32, #tpu.memory_space<vmem>>, vector<1x8x128xf32>
      tpu.vector_store %arg8[%c0_37, %c0_38, %c0_39], %41 {strides = array<i32>} : memref<1x8x128xf32, #tpu.memory_space<vmem>>, vector<1x8x128xf32>,
    } else {
    }
    %c0 = arith.constant 0 : index
    %c0_1 = arith.constant 0 : index
    %c0_2 = arith.constant 0 : index
    %c0_3 = arith.constant 0 : index
    %3 = vector.load %arg2[%c0, %c0_1, %c0_2, %c0_3] : memref<1x8x18x4xf32, #tpu.memory_space<vmem>>, vector<1x8x18x4xf32>
    %c0_4 = arith.constant 0 : index
    %c0_5 = arith.constant 0 : index
    %c0_6 = arith.constant 0 : index
    %c0_7 = arith.constant 0 : index
    %4 = vector.load %arg3[%c0_4, %c0_5, %c0_6, %c0_7] : memref<1x1x18x4xf32, #tpu.memory_space<vmem>>, vector<1x1x18x4xf32>
    %c0_8 = arith.constant 0 : index
    %c0_9 = arith.constant 0 : index
    %c0_10 = arith.constant 0 : index
    %c0_11 = arith.constant 0 : index
    %5 = vector.load %arg4[%c0_8, %c0_9, %c0_10, %c0_11] : memref<1x1x18x4xf32, #tpu.memory_space<vmem>>, vector<1x1x18x4xf32>
    %6 = tpu.concatenate %3, %4, %5 in 1 : vector<1x8x18x4xf32>, vector<1x1x18x4xf32>, vector<1x1x18x4xf32> -> vector<1x10x18x4xf32>
    %7 = vector.shape_cast %6 : vector<1x10x18x4xf32> to vector<10x18x4xf32>
    %8 = vector.extract_strided_slice %7 {offsets = [0, 0, 0], sizes = [8, 16, 4], strides = [1, 1, 1]} : vector<10x18x4xf32> to vector<8x16x4xf32>
    %9 = vector.extract_strided_slice %7 {offsets = [0, 1, 0], sizes = [8, 16, 4], strides = [1, 1, 1]} : vector<10x18x4xf32> to vector<8x16x4xf32>
    %10 = vector.extract_strided_slice %7 {offsets = [0, 2, 0], sizes = [8, 16, 4], strides = [1, 1, 1]} : vector<10x18x4xf32> to vector<8x16x4xf32>
    %11 = vector.extract_strided_slice %7 {offsets = [1, 0, 0], sizes = [8, 16, 4], strides = [1, 1, 1]} : vector<10x18x4xf32> to vector<8x16x4xf32>
    %12 = vector.extract_strided_slice %7 {offsets = [1, 1, 0], sizes = [8, 16, 4], strides = [1, 1, 1]} : vector<10x18x4xf32> to vector<8x16x4xf32>
    %13 = vector.extract_strided_slice %7 {offsets = [1, 2, 0], sizes = [8, 16, 4], strides = [1, 1, 1]} : vector<10x18x4xf32> to vector<8x16x4xf32>
    %14 = vector.extract_strided_slice %7 {offsets = [2, 0, 0], sizes = [8, 16, 4], strides = [1, 1, 1]} : vector<10x18x4xf32> to vector<8x16x4xf32>
    %15 = vector.extract_strided_slice %7 {offsets = [2, 1, 0], sizes = [8, 16, 4], strides = [1, 1, 1]} : vector<10x18x4xf32> to vector<8x16x4xf32>
    %16 = vector.extract_strided_slice %7 {offsets = [2, 2, 0], sizes = [8, 16, 4], strides = [1, 1, 1]} : vector<10x18x4xf32> to vector<8x16x4xf32>
    %17 = tpu.concatenate %8, %9, %10, %11, %12, %13, %14, %15, %16 in 2 : vector<8x16x4xf32>, vector<8x16x4xf32>, vector<8x16x4xf32>, vector<8x16x4xf32>, vector<8x16x4xf32>, vector<8x16x4xf32>, vector<8x16x4xf32>, vector<8x16x4xf32>, vector<8x16x4xf32> -> vector<8x16x36xf32>
    %18 = vector.shape_cast %17 : vector<8x16x36xf32> to vector<128x36xf32>
    %c0_12 = arith.constant 0 : index
    %c0_13 = arith.constant 0 : index
    %19 = vector.load %arg5[%c0_12, %c0_13] : memref<36x128xf32, #tpu.memory_space<vmem>>, vector<36x128xf32>
    %cst = arith.constant dense<0.000000e+00> : vector<128x128xf32>
    %20 = tpu.matmul %18, %19, %cst {dimension_numbers = #tpu.dot_dimension_numbers<[1], [0], [0], [1], [0, 0, 1, 1], [], []>} : vector<128x36xf32>, vector<36x128xf32>, vector<128x128xf32> -> vector<128x128xf32>
    %c0_14 = arith.constant 0 : index
    %c0_15 = arith.constant 0 : index
    %c0_16 = arith.constant 0 : index
    %21 = vector.load %arg7[%c0_14, %c0_15, %c0_16] : memref<1x8x128xf32, #tpu.memory_space<vmem>>, vector<1x8x128xf32>
    %cst_17 = arith.constant dense<0.000000e+00> : vector<128xf32>
    %22 = vector.multi_reduction <add>, %20, %cst_17 [0] : vector<128x128xf32> to vector<128xf32>
    %23 = vector.shape_cast %22 : vector<128xf32> to vector<1x128xf32>
    %24 = vector.shape_cast %23 : vector<1x128xf32> to vector<1x1x128xf32>
    %25 = vector.broadcast %24 : vector<1x1x128xf32> to vector<1x8x128xf32>
    %26 = arith.addf %21, %25 : vector<1x8x128xf32>
    %c0_18 = arith.constant 0 : index
    %c0_19 = arith.constant 0 : index
    %c0_20 = arith.constant 0 : index
    %27 = vector.load %arg7[%c0_18, %c0_19, %c0_20] : memref<1x8x128xf32, #tpu.memory_space<vmem>>, vector<1x8x128xf32>
    tpu.vector_store %arg7[%c0_18, %c0_19, %c0_20], %26 {strides = array<i32>} : memref<1x8x128xf32, #tpu.memory_space<vmem>>, vector<1x8x128xf32>,
    %c0_21 = arith.constant 0 : index
    %c0_22 = arith.constant 0 : index
    %c0_23 = arith.constant 0 : index
    %28 = vector.load %arg8[%c0_21, %c0_22, %c0_23] : memref<1x8x128xf32, #tpu.memory_space<vmem>>, vector<1x8x128xf32>
    %29 = arith.mulf %20, %20 : vector<128x128xf32>
    %cst_24 = arith.constant dense<0.000000e+00> : vector<128xf32>
    %30 = vector.multi_reduction <add>, %29, %cst_24 [0] : vector<128x128xf32> to vector<128xf32>
    %31 = vector.shape_cast %30 : vector<128xf32> to vector<1x128xf32>
    %32 = vector.shape_cast %31 : vector<1x128xf32> to vector<1x1x128xf32>
    %33 = vector.broadcast %32 : vector<1x1x128xf32> to vector<1x8x128xf32>
    %34 = arith.addf %28, %33 : vector<1x8x128xf32>
    %c0_25 = arith.constant 0 : index
    %c0_26 = arith.constant 0 : index
    %c0_27 = arith.constant 0 : index
    %35 = vector.load %arg8[%c0_25, %c0_26, %c0_27] : memref<1x8x128xf32, #tpu.memory_space<vmem>>, vector<1x8x128xf32>
    tpu.vector_store %arg8[%c0_25, %c0_26, %c0_27], %34 {strides = array<i32>} : memref<1x8x128xf32, #tpu.memory_space<vmem>>, vector<1x8x128xf32>,
    %36 = vector.extract_strided_slice %20 {offsets = [0, 0], sizes = [128, 8], strides = [1, 1]} : vector<128x128xf32> to vector<128x8xf32>
    %37 = vector.shape_cast %36 : vector<128x8xf32> to vector<1x8x16x8xf32>
    %c0_28 = arith.constant 0 : index
    %c0_29 = arith.constant 0 : index
    %c0_30 = arith.constant 0 : index
    %c0_31 = arith.constant 0 : index
    %38 = vector.load %arg6[%c0_28, %c0_29, %c0_30, %c0_31] : memref<1x8x16x8xf32, #tpu.memory_space<vmem>>, vector<1x8x16x8xf32>
    tpu.vector_store %arg6[%c0_28, %c0_29, %c0_30, %c0_31], %37 {strides = array<i32>} : memref<1x8x16x8xf32, #tpu.memory_space<vmem>>, vector<1x8x16x8xf32>,
    return
  }
  func.func @transform_0(%arg0: i32, %arg1: i32) -> (i32, i32, i32, i32) {
    %c0_i32 = arith.constant 0 : i32
    %c0_i32_0 = arith.constant 0 : i32
    %c0_i32_1 = arith.constant 0 : i32
    return %arg0, %arg1, %c0_i32, %c0_i32_0 : i32, i32, i32, i32
  }
  func.func @transform_1(%arg0: i32, %arg1: i32) -> (i32, i32, i32, i32) {
    %c8_i32 = arith.constant 8 : i32
    %0 = arith.muli %arg1, %c8_i32 : i32
    %c8_i32_0 = arith.constant 8 : i32
    %1 = arith.addi %0, %c8_i32_0 : i32
    %c0_i32 = arith.constant 0 : i32
    %c0_i32_1 = arith.constant 0 : i32
    %c0_i32_2 = arith.constant 0 : i32
    return %arg0, %1, %c0_i32, %c0_i32_1 : i32, i32, i32, i32
  }
  func.func @transform_2(%arg0: i32, %arg1: i32) -> (i32, i32, i32, i32) {
    %c8_i32 = arith.constant 8 : i32
    %0 = arith.muli %arg1, %c8_i32 : i32
    %c8_i32_0 = arith.constant 8 : i32
    %1 = arith.addi %0, %c8_i32_0 : i32
    %c1_i32 = arith.constant 1 : i32
    %2 = arith.addi %1, %c1_i32 : i32
    %c0_i32 = arith.constant 0 : i32
    %c0_i32_1 = arith.constant 0 : i32
    %c0_i32_2 = arith.constant 0 : i32
    return %arg0, %2, %c0_i32, %c0_i32_1 : i32, i32, i32, i32
  }
  func.func @transform_3(%arg0: i32, %arg1: i32) -> (i32, i32) {
    %c0_i32 = arith.constant 0 : i32
    %c0_i32_0 = arith.constant 0 : i32
    %c0_i32_1 = arith.constant 0 : i32
    return %c0_i32, %c0_i32_0 : i32, i32
  }
  func.func @transform_4(%arg0: i32, %arg1: i32) -> (i32, i32, i32, i32) {
    %c0_i32 = arith.constant 0 : i32
    %c0_i32_0 = arith.constant 0 : i32
    %c0_i32_1 = arith.constant 0 : i32
    return %arg0, %arg1, %c0_i32, %c0_i32_0 : i32, i32, i32, i32
  }
  func.func @transform_5(%arg0: i32, %arg1: i32) -> (i32, i32, i32) {
    %c0_i32 = arith.constant 0 : i32
    %c0_i32_0 = arith.constant 0 : i32
    %c0_i32_1 = arith.constant 0 : i32
    return %arg0, %c0_i32, %c0_i32_0 : i32, i32, i32
  }
  func.func @transform_6(%arg0: i32, %arg1: i32) -> (i32, i32, i32) {
    %c0_i32 = arith.constant 0 : i32
    %c0_i32_0 = arith.constant 0 : i32
    %c0_i32_1 = arith.constant 0 : i32
    return %arg0, %c0_i32, %c0_i32_0 : i32, i32, i32
  }
}

</mosaic_0001>

<bundles_post_ra>
// kernel: tpu_custom_call.1
= control target key start
LH: loop header
LB: loop body
LE: loop exit
PB: predicated region body
PF: predicated region fallthrough
CT: control target
= control target key end

     0   :  { %s3539_s0 = inlined_call_operand.hbm [shape: f32[2,18,18,4], index: 0, kind: input, shape index: {}]   ;;  %s3540_s1 = inlined_call_operand.hbm [shape: f32[2,18,18,4], index: 1, kind: input, shape index: {}]   ;;  %s3541_s2 = inlined_call_operand.hbm [shape: f32[2,18,18,4], index: 2, kind: input, shape index: {}]   ;;  %s3542_s3 = inlined_call_operand.hbm [shape: f32[36,128], index: 3, kind: input, shape index: {}]   ;;  %s3543_s4 = inlined_call_operand.hbm [shape: f32[2,16,16,8], index: 4, kind: output, shape index: {0}]   ;;  %s3544_s5 = inlined_call_operand.hbm [shape: f32[2,8,128], index: 5, kind: output, shape index: {1}]   ;;  %s3545_s6 = inlined_call_operand.hbm [shape: f32[2,8,128], index: 6, kind: output, shape index: {2}]  }
   0x1   :  { %3582 = sst [smem:[#allocation40_spill]] %s3539_s0 }
   0x2   :  { %3583 = sst [smem:[#allocation41_spill]] %s3540_s1 }
   0x3   :  { %3584 = sst [smem:[#allocation42_spill]] %s3541_s2 }
   0x4   :  { %3585 = sst [smem:[#allocation43_spill]] %s3542_s3 }
   0x5   :  { %3586 = sst [smem:[#allocation44_spill]] %s3543_s4 }
   0x6   :  { %3587 = sst [smem:[#allocation45_spill]] %s3544_s5 }
   0x7   :  { %3588 = sst [smem:[#allocation46_spill]] %s3545_s6 }
   0x8   :  { %12 = vsyncpa [#allocation3], 0 }
   0x9   :  { %14 = vsyncpa [#allocation3 + $0x1], 0 }
   0xa   :  { %15 = vsyncpa [#allocation6], 0 }
   0xb   :  { %17 = vsyncpa [#allocation6 + $0x1], 0 }
   0xc   :  { %18 = vsyncpa [#allocation9], 0 }
   0xd   :  { %19 = vsyncpa [#allocation4], 0 }
   0xe   :  { %21 = vsyncpa [#allocation4 + $0x1], 0 }
   0xf   :  { %22 = vsyncpa [#allocation12], 0 }
  0x10   :  { %24 = vsyncpa [#allocation12 + $0x1], 0  ;;  %s2414_s21 = smov 0   ;;  %s2416_s22 = smov 0  }
  0x11   :  { %s2418_s23 = smov 0   ;;  %s2420_s24 = smov 0  }
  0x12   :  { %s2422_s25 = smov 0   ;;  %s2424_s26 = smov 0  }
  0x13   :  { %s2426_s27 = smov 0   ;;  %s2428_s28 = smov 0  }
  0x14   :  { %s2430_s29 = smov 0   ;;  %s2432_s30 = smov 0  }
  0x15   :  { %s2434_s7 = smov 0   ;;  %s2436_s8 = smov 0  }
  0x16   :  { %s2438_s9 = smov 0   ;;  %s2440_s10 = smov 0  }
  0x17   :  { %s2442_s11 = smov 0   ;;  %s2444_s12 = smov 0  }
  0x18   :  { %s2446_s13 = smov 0  }
  0x19 LB: > { %3589 = sst [smem:[#allocation20_spill]] %s2294_s22  ;;  %s2500_s14 = sadd.s32 4294967295, %s2354_s13   ;;  %s2354_s13 = sphi %s2446_s13, %s30_s13   ;;  %s2350_s12 = sphi %s2444_s12, %s3684_s12   ;;  %s2346_s11 = sphi %s2442_s11, %s3674_s11   ;;  %s2342_s10 = sphi %s2440_s10, %s3683_s10   ;;  %s2338_s9 = sphi %s2438_s9, %s3673_s9   ;;  %s2334_s8 = sphi %s2436_s8, %s3672_s8   ;;  %s2330_s7 = sphi %s2434_s7, %s3682_s7   ;;  %s2326_s30 = sphi %s2432_s30, %s3681_s30   ;;  %s2322_s29 = sphi %s2430_s29, %s3680_s29   ;;  %s2318_s28 = sphi %s2428_s28, %s3679_s28   ;;  %s2314_s27 = sphi %s2426_s27, %s3678_s27   ;;  %s2310_s26 = sphi %s2424_s26, %s3677_s26   ;;  %s2306_s25 = sphi %s2422_s25, %s3676_s25   ;;  %s2302_s24 = sphi %s2420_s24, %s3668_s24   ;;  %s2298_s23 = sphi %s2418_s23, %s3667_s23   ;;  %s2294_s22 = sphi %s2416_s22, %s3666_s22   ;;  %s2290_s21 = sphi %s2414_s21, %s3665_s21  }
  0x1a   : > { %3590 = sst [smem:[#allocation21_spill]] %s2298_s23  ;;  %s39_s16 = sadd.s32 1, %s2346_s11 }
  0x1b   : > { %3591 = sst [smem:[#allocation22_spill]] %s2306_s25  ;;  %s42_s17 = sadd.s32 1, %s2350_s12 }
  0x1c   : > { %3592 = sst [smem:[#allocation23_spill]] %s2326_s30  ;;  %p40_p0 = scmp.ge.s32.totalorder %s39_s16, 2 }
  0x1d   : > { %3593 = sst [smem:[#allocation24_spill]] %s2334_s8  ;;  %s51_s18 = sadd.s32 1, %s2334_s8 }
  0x1e   : > { %3594 = sst [smem:[#allocation25_spill]] %s2338_s9  ;;  %p58_p1 = scmp.ne.s32.totalorder %s2334_s8, %s2330_s7 }
  0x1f   : > { %3595 = sst [smem:[#allocation26_spill]] %s2342_s10  ;;  %p59_p2 = scmp.eq.s32.totalorder %s2354_s13, 0 }
  0x20   : > { %3596 = sst [smem:[#allocation27_spill]] %s2346_s11  ;;  %s3686_s16 = smov (%p40_p0, %s39_s16), 0 }
  0x21   : > { %3597 = sst [smem:[#allocation28_spill]] %s3686_s16  ;;  %s3688_s17 = smov (!%p40_p0, %s42_s17), %s2350_s12 }
  0x22   : > { %s47_s19 = ssub.s32 %s2346_s11, %s3686_s16  ;;  %p2519_p3 = por %p59_p2, %p58_p1 }
  0x23   : > { %p44_p4 = scmp.ge.s32.totalorder %s3688_s17, 2  ;;  %p3556_p5 = scmp.ne.s32.totalorder %s2330_s7, %s2326_s30 }
  0x24   : > { %s3598_s20 = scalar_select %p2519_p3, 1, 0 }
  0x25   : > { %p3559_p6 = scmp.eq.s32.totalorder %s2500_s14, 0  ;;  %s1678_s15 = sshll.u32 %s2346_s11, 3 }
  0x26   : > { %s3690_s17 = smov (%p44_p4, %s3688_s17), 0  ;;  %s75_s5 = sadd.s32 8, %s1678_s15 }
  0x27   : > { %3599 = sst [smem:[#allocation29_spill]] %s3690_s17  ;;  %p2534_p7 = por %p3559_p6, %p3556_p5 }
  0x28   : > { %s2540_s4 = ssub.s32 %s2350_s12, %s3690_s17  ;;  %s1679_s10 = sshll.u32 %s3686_s16, 3 }
  0x29   : > { %s3600_s6 = scalar_select %p2534_p7, 1, 0 }
  0x2a   : > { %s48_s9 = sor.u32 %s47_s19, %s2540_s4  ;;  %s77_s2 = sadd.s32 8, %s1679_s10 }
  0x2b   : > { %3601 = sst [smem:[#allocation30_spill]] %s3600_s6  ;;  %p49_p8 = scmp.eq.s32.totalorder %s48_s9, 0 }
  0x2c   : > { %s79_s1 = ssub.s32 %s75_s5, %s77_s2  ;;  %s83_s6 = sadd.s32 1, %s2322_s29 }
  0x2d   : > { %s80_s0 = sor.u32 %s79_s1, %s2540_s4  ;;  %p90_p10 = scmp.ne.s32.totalorder %s2322_s29, %s2318_s28 }
  0x2e   : > { %s2547_s11 = scalar_select %p49_p8, %s2334_s8, %s51_s18  }
  0x2f   : > { %p81_p9 = scmp.eq.s32.totalorder %s80_s0, 0  ;;  %p96_p11 = scmp.ne.s32.totalorder %s2318_s28, %s2314_s27 }
  0x30   : > { %3602 = sst [smem:[#allocation31_spill]] %s2547_s11  ;;  %s107_s19 = sadd.s32 9, %s1678_s15 }
  0x31   : > { %s2554_s9 = scalar_select %p81_p9, %s2322_s29, %s83_s6  }
  0x32   : > { %p2558_p12 = por %p90_p10, %p59_p2  ;;  %p2564_p13 = por %p96_p11, %p3559_p6 }
  0x33   : > { %3603 = sst [smem:[#allocation32_spill]] %s2554_s9  ;;  %s109_s2 = sadd.s32 9, %s1679_s10 }
  0x34   : > { %s3604_s1 = scalar_select %p2558_p12, 1, 0 }
  0x35   : > { %s3605_s0 = scalar_select %p2564_p13, 1, 0 }
  0x36   : > { %s115_s5 = sadd.s32 1, %s2310_s26  ;;  %s111_s6 = ssub.s32 %s107_s19, %s109_s2 }
  0x37   : > { %p122_p0 = scmp.ne.s32.totalorder %s2310_s26, %s2306_s25  ;;  %s112_s27 = sor.u32 %s111_s6, %s2540_s4 }
  0x38   : > { %p128_p4 = scmp.ne.s32.totalorder %s2306_s25, %s2302_s24  ;;  %p113_p8 = scmp.eq.s32.totalorder %s112_s27, 0 }
  0x39   : > { %p2576_p9 = por %p122_p0, %p59_p2  ;;  %p175_p11 = scmp.eq.s32.totalorder %s2500_s14, 3 }
  0x3a   : > { %p2582_p10 = por %p128_p4, %p3559_p6  ;;  %s3612_s24 = sadd.s32 4294967294, %s2354_s13  }
  0x3b   : > { %s3606_s15 = scalar_select %p2576_p9, 1, 0 }
  0x3c   : > { %s3607_s10 = scalar_select %p2582_p10, 1, 0 }
  0x3d   : > { %s2588_s18 = scalar_select %p113_p8, %s2310_s26, %s115_s5  }
  0x3e   : > { %3608 = sst [smem:[#allocation33_spill]] %s3607_s10  ;;  %p2593_p5 = por %p175_p11, %p58_p1 }
  0x3f   : > { %3609 = sst [smem:[#allocation34_spill]] %s2588_s18  ;;  %p181_p13 = scmp.eq.s32.totalorder %s3612_s24, 3 }
  0x40   : > { %s3610_s19 = scalar_select %p2593_p5, 1, 0 }
  0x41   : > { %p188_p2 = scmp.eq.s32.totalorder %s2540_s4, 0  ;;  %s190_s2 = sadd.s32 1, %s2298_s23 }
  0x42   : > { %3611 = sst [smem:[#allocation35_spill]] %s3610_s19  ;;  %p3613_p0 = scmp.ne.s32.totalorder %s2330_s7, %s2326_s30 }
  0x43   : > { %p200_p4 = scmp.ne.s32.totalorder %s2298_s23, %s2294_s22  ;;  %p206_p1 = scmp.ne.s32.totalorder %s2294_s22, %s2290_s21 }
  0x44   : > { %p2604_p7 = por %p181_p13, %p3613_p0  ;;  %p1682_p6 = scmp.ge.s32.totalorder %s2354_s13, 1 }
  0x45   : > { %s2611_s27 = scalar_select %p188_p2, %s2298_s23, %s190_s2  }
  0x46   : > { %s3614_s6 = scalar_select %p2604_p7, 1, 0 }
  0x47   : > { %3616 = sst [smem:[#allocation37_spill]] %s2611_s27  ;;  %p2613_p8 = por %p200_p4, %p175_p11 }
  0x48   : > { %3615 = sst [smem:[#allocation36_spill]] %s3614_s6  ;;  %p240_p5 = scmp.lt.s32.totalorder %s2354_s13, 5 }
  0x49   : > { %s3617_s5 = scalar_select %p2613_p8, 1, 0 }
  0x4a   : > { %p2621_p10 = por %p206_p1, %p181_p13  ;;  %p2625_p9 = pnand %p1682_p6, %p240_p5 }
  0x4b   : > { %3618 = sst [smem:[#allocation38_spill]] %s3617_s5  ;;  %s2356_s17 = smov [#allocation8]  }
  0x4c   : > { %s3619_s24 = scalar_select %p2621_p10, 1, 0 }
  0x4d   : > { %s3621_s4 = scalar_select %p2625_p9, 1, 0 }
  0x4e   : > { %3620 = sst [smem:[#allocation39_spill]] %s3619_s24  ;;  %s252_s16 = sshll.u32 %s2356_s17, 4  ;;  %s253_s16 = int_to_ptr.vmem [resolvable:$true] %s252_s16 }
  0x4f   : > { %p1826_p2 = pneg %p2625_p9  ;;  %p3622_p11 = scmp.eq.s32.totalorder %s2500_s14, 0 }
  0x50   : > { %s3624_s3 = sld [smem:[#allocation43_spill]] }
  0x51   : > { %p2633_p0 = pnand %p1826_p2, %p3622_p11 }
  0x53   : > { %p1998_p6 = pneg %p2633_p0 }
  0x56   : > { %s1996_s9 = scalar_lea.hbm %s3624_s3, 640 }
  0x57   : > { %p1997_p5 = scmp.ne.s32.totalorder %s3624_s3, %s1996_s9  ;;  %p2003_p1 = scmp.lt.u32.totalorder %s1996_s9, %s3624_s3 }
  0x59   : > { %p1999_p13 = pnand %p1998_p6, %p1997_p5 }
  0x5b   : > { %p2000_p4 = pneg %p1999_p13 }
  0x5d   : > { %p2005_p2 = pnand %p2003_p1, %p2000_p4 }
  0x5f   : > { %2008 = shalt.err (!%p2005_p2)
}
  0x60   : > { %s2009_s24 = scalar_lea.vmem %s253_s16, 640  ;;  %p2017_p8 = scmp.lt.s32.totalorder %s253_s16, %s253_s16 }
  0x61   : > { %p2010_p11 = scmp.ne.s32.totalorder %s253_s16, %s2009_s24  ;;  %p2018_p9 = scmp.lt.s32.totalorder %s2009_s24, %s2009_s24 }
  0x63   : > { %p2012_p10 = pnand %p2010_p11, %p1998_p6  ;;  %p2019_p12 = por %p2018_p9, %p2017_p8 }
  0x65   : > { %p2013_p7 = pneg %p2012_p10 }
  0x67   : > { %p2020_p3 = pnand %p2019_p12, %p2013_p7 }
  0x69   : > { %2023 = shalt.err (!%p2020_p3)
}
  0x6a   : > { %s2357_s11 = smov 128   ;;  %s2358_s18 = smov 8  }
  0x6b   : > { %1829 = dma.hbm_to_vmem [thread:$0]  (!%p2633_p0), %s3624_s3, 640, %s253_s16, [#allocation9], %s2357_s11, %s2357_s11, %s2358_s18  }
  0x6c   : > { %p1684_p5 = scmp.ge.s32.totalorder %s2354_s13, 4 }
  0x6d   : > { %p3625_p13 = scmp.ne.s32.totalorder (!%p1684_p5), %s3598_s20, 0 }
  0x6e   : > { %262 = sbr.rel (%p1684_p5) target bundleno = 209 (0xd1), region = 20 }
  0x75   : > { %265 = sbr.rel (!%p3625_p13) target bundleno = 150 (0x96), region = 24  ;;  %s3626_s23 = sld [smem:[#allocation27_spill]] (%p3625_p13) }
  0x76   : > { %s266_s9 = sand.u32 (%p3625_p13), 1, %s2334_s8   ;;  %s1805_s2 = smul.u32 (%p3625_p13), 54, %s2350_s12 }
  0x77   : > { %s1803_s24 = smul.u32 (%p3625_p13), 192, %s266_s9  ;;  %s2657_s17 = scalar_lea.sflag (%p3625_p13), [#allocation3], %s266_s9 }
  0x78   : > { %s3627_s21 = sld [smem:[#allocation40_spill]] (%p3625_p13) }
  0x79   : > { %s270_s6 = scalar_lea.vmem (%p3625_p13), [#allocation2], %s1803_s24 }
  0x7a   : > { %s288_s5 = sshll.u32 (%p3625_p13), %s270_s6, 4  ;;  %s2661_s5 = int_to_ptr.vmem [resolvable:$true] %s288_s5 }
  0x7b   : > { %s1804_s30 = smul.u32 (%p3625_p13), 24, %s3626_s23 }
  0x7d   : > { %s283_s16 = sadd.s32 %s1805_s2, %s1804_s30 }
  0x7e   : > { %s1690_s11 = sshll.u32 %s283_s16, 7  ;;  %s3628_s3 = smov %s3627_s21 }
  0x7f   : > { %s285_s20 = scalar_lea.hbm %s3627_s21, %s1690_s11  ;;  %s2028_s8 = scalar_lea.hbm %s3628_s3, 13824 }
  0x80   : > { %s2024_s19 = scalar_lea.hbm %s285_s20, 3072  ;;  %p2029_p7 = scmp.lt.u32.totalorder %s285_s20, %s3628_s3 }
  0x81   : > { %p2025_p3 = scmp.ne.s32.totalorder %s285_s20, %s2024_s19  ;;  %p2030_p12 = scmp.lt.u32.totalorder %s2028_s8, %s2024_s19 }
  0x82   : > { %p2032_p10 = scmp.lt.u32.totalorder %s2024_s19, %s285_s20 }
  0x83   : > { %p2031_p9 = por %p2030_p12, %p2029_p7 }
  0x85   : > { %p2033_p8 = por %p2032_p10, %p2031_p9 }
  0x87   : > { %p2034_p0 = pnand %p2033_p8, %p2025_p3 }
  0x89   : > { %2037 = shalt.err (!%p2034_p0)
}
  0x8a   : > { %s2038_s30 = scalar_lea.vmem %s2661_s5, 3072  ;;  %s2359_s6 = smov [#allocation2]  }
  0x8b   : > { %p2039_p6 = scmp.ne.s32.totalorder %s2661_s5, %s2038_s30  ;;  %s2042_s23 = sshll.u32 %s2359_s6, 4  ;;  %s2043_s23 = int_to_ptr.vmem [resolvable:$false] %s2042_s23 }
  0x8c   : > { %s2044_s22 = scalar_lea.vmem %s2043_s23, 6144  ;;  %p2045_p4 = scmp.lt.s32.totalorder %s2661_s5, %s2043_s23 }
  0x8d   : > { %p2046_p1 = scmp.lt.s32.totalorder %s2044_s22, %s2038_s30 }
  0x8f   : > { %p2047_p2 = por %p2046_p1, %p2045_p4 }
  0x91   : > { %p2048_p11 = pnand %p2047_p2, %p2039_p6 }
  0x93   : > { %2051 = shalt.err (!%p2048_p11)
}
  0x94   : > { %s2360_s25 = smov 128   ;;  %s2361_s8 = smov 8  }
  0x95   : > { %294 = dma.hbm_to_vmem [thread:$0]  %s285_s20, 3072, %s2661_s5, %s2657_s17, %s2360_s25, %s2360_s25, %s2361_s8  }
  0x96 PF: > { %s3629_s10 = sld [smem:[#allocation27_spill]]  ;;  %s298_s19 = sand.u32 1, %s2354_s13  }
  0x97   : > { %s300_s24 = sand.u32 1, %s2322_s29   ;;  %s1527_s11 = smul.u32 54, %s2350_s12 }
  0x98   : > { %s1806_s2 = smul.u32 24, %s300_s24  ;;  %s3630_s17 = sld [smem:[#allocation41_spill]] }
  0x99   : > { %s325_s6 = sand.u32 1, %s2310_s26   ;;  %s3631_s8 = sld [smem:[#allocation42_spill]] }
  0x9a   : > { %s302_s18 = scalar_lea.vmem [#allocation5], %s1806_s2  ;;  %s2694_s24 = scalar_lea.sflag [#allocation6], %s298_s19 }
  0x9b   : > { %s313_s27 = sshll.u32 %s302_s18, 4  ;;  %p3633_p13 = scmp.ne.s32.totalorder %s3604_s1, 0  ;;  %s2681_s27 = int_to_ptr.vmem [resolvable:$true] %s313_s27 }
  0x9c   : > { %s1694_s16 = smul.u32 24, %s3629_s10 }
  0x9e   : > { %s1528_s21 = sadd.s32 %s1694_s16, %s1527_s11  ;;  %s2056_s18 = scalar_lea.hbm %s3630_s17, 13824 }
  0x9f   : > { %s1695_s9 = sshll.u32 %s1528_s21, 7  ;;  %s3632_s3 = smov %s3631_s8 }
  0xa0   : > { %s1530_s20 = scalar_lea.hbm %s3630_s17, %s1695_s9  ;;  %s2692_s10 = scalar_lea.hbm %s3631_s8, %s1695_s9 }
  0xa1   : > { %s2687_s23 = scalar_lea.hbm %s1530_s20, 3072  ;;  %s2080_s2 = scalar_lea.hbm %s1530_s20, 3456 }
  0xa2   : > { %p2053_p5 = scmp.ne.s32.totalorder %s2687_s23, %s2080_s2  ;;  %p2057_p12 = scmp.lt.u32.totalorder %s2687_s23, %s3630_s17 }
  0xa3   : > { %p2058_p9 = scmp.lt.u32.totalorder %s2056_s18, %s2080_s2  ;;  %p2060_p8 = scmp.lt.u32.totalorder %s2080_s2, %s2687_s23 }
  0xa4   : > { %p2054_p3 = pnand %p2053_p5, %p3633_p13 }
  0xa5   : > { %p2059_p10 = por %p2058_p9, %p2057_p12 }
  0xa6   : > { %p2055_p7 = pneg %p2054_p3 }
  0xa7   : > { %p2061_p0 = por %p2060_p8, %p2059_p10 }
  0xa9   : > { %p2062_p6 = pnand %p2061_p0, %p2055_p7 }
  0xab   : > { %2065 = shalt.err (!%p2062_p6)
}
  0xac   : > { %s2066_s19 = scalar_lea.vmem %s2681_s27, 384  ;;  %s2362_s9 = smov [#allocation5]  }
  0xad   : > { %p2067_p4 = scmp.ne.s32.totalorder %s2681_s27, %s2066_s19  ;;  %s2070_s5 = sshll.u32 %s2362_s9, 4  ;;  %s2071_s5 = int_to_ptr.vmem [resolvable:$false] %s2070_s5 }
  0xae   : > { %s2072_s20 = scalar_lea.vmem %s2071_s5, 768  ;;  %p2073_p11 = scmp.lt.s32.totalorder %s2681_s27, %s2071_s5 }
  0xaf   : > { %p2068_p1 = pnand %p2067_p4, %p3633_p13  ;;  %p2074_p5 = scmp.lt.s32.totalorder %s2072_s20, %s2066_s19 }
  0xb1   : > { %p2069_p2 = pneg %p2068_p1  ;;  %p2075_p3 = por %p2074_p5, %p2073_p11 }
  0xb3   : > { %p2076_p12 = pnand %p2075_p3, %p2069_p2 }
  0xb5   : > { %2079 = shalt.err (!%p2076_p12)
}
  0xb6   : > { %s2363_s22 = smov 128   ;;  %s2364_s25 = smov 8  }
  0xb7   : > { %1813 = dma.hbm_to_vmem [thread:$0]  (%p3633_p13), %s2687_s23, 384, %s2681_s27, %s2694_s24, %s2363_s22, %s2363_s22, %s2364_s25  }
  0xb8   : > { %s1807_s8 = smul.u32 24, %s325_s6  ;;  %s2723_s2 = scalar_lea.hbm %s2692_s10, 3456 }
  0xb9   : > { %s2109_s18 = scalar_lea.hbm %s2692_s10, 3840  ;;  %p3634_p9 = scmp.ne.s32.totalorder %s3606_s15, 0 }
  0xba   : > { %s327_s16 = scalar_lea.vmem [#allocation7], %s1807_s8  ;;  %p2082_p7 = scmp.ne.s32.totalorder %s2723_s2, %s2109_s18 }
  0xbb   : > { %s338_s11 = sshll.u32 %s327_s16, 4  ;;  %s2085_s27 = scalar_lea.hbm %s3632_s3, 13824  ;;  %s2725_s11 = int_to_ptr.vmem [resolvable:$true] %s338_s11 }
  0xbc   : > { %p2083_p10 = pnand %p2082_p7, %p3634_p9  ;;  %p2086_p13 = scmp.lt.u32.totalorder %s2723_s2, %s3632_s3 }
  0xbd   : > { %p2087_p0 = scmp.lt.u32.totalorder %s2085_s27, %s2109_s18  ;;  %p2089_p4 = scmp.lt.u32.totalorder %s2109_s18, %s2723_s2 }
  0xbe   : > { %p2084_p8 = pneg %p2083_p10 }
  0xbf   : > { %p2088_p6 = por %p2087_p0, %p2086_p13 }
  0xc1   : > { %p2090_p1 = por %p2089_p4, %p2088_p6 }
  0xc3   : > { %p2091_p2 = pnand %p2090_p1, %p2084_p8 }
  0xc5   : > { %2094 = shalt.err (!%p2091_p2)
}
  0xc6   : > { %s2095_s10 = scalar_lea.vmem %s2725_s11, 384  ;;  %s2365_s30 = smov [#allocation7]  }
  0xc7   : > { %p2096_p11 = scmp.ne.s32.totalorder %s2725_s11, %s2095_s10  ;;  %s2099_s19 = sshll.u32 %s2365_s30, 4  ;;  %s2100_s19 = int_to_ptr.vmem [resolvable:$false] %s2099_s19 }
  0xc8   : > { %s2101_s9 = scalar_lea.vmem %s2100_s19, 768  ;;  %p2102_p12 = scmp.lt.s32.totalorder %s2725_s11, %s2100_s19 }
  0xc9   : > { %p2097_p5 = pnand %p2096_p11, %p3634_p9  ;;  %p2103_p7 = scmp.lt.s32.totalorder %s2101_s9, %s2095_s10 }
  0xcb   : > { %p2098_p3 = pneg %p2097_p5  ;;  %p2104_p10 = por %p2103_p7, %p2102_p12 }
  0xcd   : > { %p2105_p13 = pnand %p2104_p10, %p2098_p3 }
  0xcf   : > { %2108 = shalt.err (!%p2105_p13)
}
  0xd0   : > { %1814 = dma.hbm_to_vmem [thread:$0]  (%p3634_p9), %s2723_s2, 384, %s2725_s11, %s2694_s24, %s2363_s22, %s2363_s22, %s2364_s25  }
  0xd1 PF: > { %p3635_p8 = scmp.ne.s32.totalorder %s3621_s4, 0 }
  0xd2   : > { %s3636_s5 = sld [smem:[#allocation30_spill]] (!%p3635_p8)  ;;  %s2755_s20 = sand.u32 (!%p3635_p8), 1, %s2330_s7  }
  0xd3   : > { %350 = sbr.rel (%p3635_p8) target bundleno = 911 (0x38f), region = 36  ;;  %s353_s16 = scalar_lea.sflag (!%p3635_p8), [#allocation3], %s2755_s20 }
  0xd4   : > { %s1808_s8 = smul.u32 (!%p3635_p8), 192, %s2755_s20 }
  0xd6   : > { %s2759_s15 = scalar_lea.vmem (!%p3635_p8), [#allocation2], %s1808_s8 }
  0xd8   : > { %p3637_p0 = scmp.ne.s32.totalorder (!%p3635_p8), %s3636_s5, 0 }
  0xda   : > { %2263 = dma.done.wait (%p3637_p0), %s353_s16, 3072  }
  0xdb   : > { %2265 = vsyncadd (%p3637_p0), %s353_s16, 4294964224  ;;  %s361_s4 = sand.u32 1, %s2500_s14   ;;  %s363_s24 = sand.u32 1, %s2318_s28  }
  0xdc   : > { %s1809_s22 = smul.u32 24, %s363_s24  ;;  %s362_s25 = scalar_lea.sflag [#allocation6], %s361_s4 }
  0xdd   : > { %p3638_p9 = scmp.ne.s32.totalorder %s3605_s0, 0 }
  0xde   : > { %s2769_s2 = scalar_lea.vmem [#allocation5], %s1809_s22 }
  0xdf   : > { %2267 = dma.done.wait (%p3638_p9), %s362_s25, 384  }
  0xe0   : > { %2269 = vsyncadd (%p3638_p9), %s362_s25, 4294966912  ;;  %s3639_s11 = sld [smem:[#allocation22_spill]]  ;;  %s3640_s18 = sld [smem:[#allocation33_spill]] }
  0xe6   : > { %s372_s1 = sand.u32 1, %s3639_s11   ;;  %p3641_p6 = scmp.ne.s32.totalorder %s3640_s18, 0 }
  0xe7   : > { %s1810_s21 = smul.u32 24, %s372_s1 }
  0xe9   : > { %s2776_s27 = scalar_lea.vmem [#allocation7], %s1810_s21 }
  0xea   : > { %2271 = dma.done.wait (%p3641_p6), %s362_s25, 384  }
  0xeb   : > { %2273 = vsyncadd (%p3641_p6), %s362_s25, 4294966912  ;;  %p3642_p4 = scmp.eq.s32.totalorder %s2500_s14, 0 }
  0xed   : > { %2275 = dma.done.wait (%p3642_p4), [#allocation9], 640   ;;  %p3643_p1 = pmov %p3642_p4 }
  0xee   : > { %s3644_s0 = sld [smem:[#allocation20_spill]]  ;;  %s1701_s23 = sshll.u32 %s2755_s20, 7 }
  0xef   : > { %2277 = vsyncadd (%p3643_p1), [#allocation9], 4294966656  ;;  %s2788_s30 = scalar_lea.vmem [#allocation10], %s1701_s23  ;;  %s3645_s5 = sld [smem:[#allocation25_spill]] }
  0xf4   : > { %s417_s6 = sand.u32 1, %s3644_s0  }
  0xf5   : > { %s1702_s10 = sshll.u32 %s417_s6, 3  ;;  %p1704_p2 = scmp.ne.s32.totalorder %s3645_s5, 0 }
  0xf6   : > { %s2790_s19 = scalar_lea.vmem [#allocation11], %s1702_s10  ;;  %s2792_s9 = scalar_lea.vmem [#allocation13], %s1702_s10  ;;  %v2366_v0 = vmov (!%p1704_p2), 0.0  }
  0xf7   : > { %441 = sbr.rel (%p1704_p2) target bundleno = 254 (0xfe), region = 56  ;;  %442 = vst [vmem:[%s2790_s19] sm:$0xff] (!%p1704_p2), %v2366_v0  ;;  %443 = vst [vmem:[%s2792_s9] sm:$0xff] (!%p1704_p2), %v2366_v0 }
  0xfe PF: > { %v2798_v1 = vld [vmem:[%s2759_s15] sm:$0xff]  ;;  %v2801_v2 = vld [vmem:[%s2759_s15 + $0x8] sm:$0xff]  ;;  %vm587_vm0 = vcmask 1045504   ;;  %vm498_vm1 = vcmask 1046528   ;;  %v446_v7 = vld [vmem:[%s2759_s15 + $0x10] sm:$0x3] }
  0xff   : > { %v588_v3 = vrot.slane %v2798_v1, 2  ;;  %v589_v4 = vrot.slane %v2801_v2, 2  ;;  %v499_v5 = vrot.slane %v2798_v1, 1  ;;  %v500_v6 = vrot.slane %v2801_v2, 1  ;;  %s2367_s8 = smov 8   ;;  %s2368_s16 = smov 4  }
 0x100   : > { %v591_v8 = vrot.slane %v446_v7, 2  ;;  %v502_v9 = vrot.slane %v446_v7, 1  ;;  %v2815_v14 = vld [vmem:[%s2759_s15 + $0x20] sm:$0xff]  ;;  %v2818_v15 = vld [vmem:[%s2759_s15 + $0x18] sm:$0xff]  ;;  %v449_v18 = vld [vmem:[%s2759_s15 + $0x28] sm:$0x3] }
 0x101   : > { %v590_v10 = vsel %vm587_vm0, %v588_v3, %v589_v4  ;;  %v501_v11 = vsel %vm498_vm1, %v499_v5, %v500_v6  ;;  %v504_v16 = vrot.slane %v2818_v15, 1  ;;  %v505_v17 = vrot.slane %v2815_v14, 1  ;;  %s2369_s24 = smov 12   ;;  %s2370_s22 = smov 16   ;;  %v2841_v26 = vld [vmem:[%s2759_s15 + $0x30] sm:$0xff]  ;;  %v2845_v28 = vld [vmem:[%s2759_s15 + $0x38] sm:$0xff] }
 0x102   : > { %628 = vrot.lane.b32.xlu1 %v590_v10, %s2367_s8  ;;  %539 = vrot.lane.b32.xlu0 %v501_v11, %s2368_s16  ;;  %v592_v12 = vsel %vm587_vm0, %v589_v4, %v591_v8  ;;  %v503_v13 = vsel %vm498_vm1, %v500_v6, %v502_v9  ;;  %v593_v20 = vrot.slane %v2818_v15, 2  ;;  %v594_v21 = vrot.slane %v2815_v14, 2  ;;  %s2371_s25 = smov 20   ;;  %v1126_v29 = vld [vmem:[#allocation8] sm:$0xff]  ;;  %v1127_v30 = vld [vmem:[#allocation8 + $0x8] sm:$0xff]  ;;  %s2372_s11 = smov 24  }
 0x103   : > { %v506_v19 = vsel %vm498_vm1, %v504_v16, %v505_v17  ;;  %v507_v22 = vrot.slane %v449_v18, 1  ;;  %v596_v25 = vrot.slane %v449_v18, 2  ;;  %v1789_v31 = vpack.c.bf16 %v1127_v30, %v1126_v29  ;;  %v1128_v34 = vld [vmem:[#allocation8 + $0x10] sm:$0xff]  ;;  %v1129_v35 = vld [vmem:[#allocation8 + $0x18] sm:$0xff]  ;;  %v452_v38 = vld [vmem:[%s2759_s15 + $0x40] sm:$0x3] }
 0x104   : > { %v595_v23 = vsel %vm587_vm0, %v593_v20, %v594_v21  ;;  %v509_v32 = vrot.slane %v2841_v26, 1  ;;  %v510_v33 = vrot.slane %v2845_v28, 1  ;;  %v1793_v37 = vpack.c.bf16 %v1129_v35, %v1128_v34  ;;  %s2373_s18 = smov 28   ;;  %v1130_v39 = vld [vmem:[#allocation8 + $0x20] sm:$0xf]  ;;  %s2374_s1 = smov 32  }
 0x105   : > { %v508_v24 = vsel %vm498_vm1, %v505_v17, %v507_v22  ;;  %v597_v27 = vsel %vm587_vm0, %v594_v21, %v596_v25  ;;  %1790 = vmatprep.subr.bf16.mxu0 %v1789_v31  ;;  %1797 = vmatprep.subr.bf16.mxu1 %v1789_v31  ;;  %vm1180_vm2 = vcmask 1043456   ;;  %v598_v40 = vrot.slane %v2841_v26, 2  ;;  %v2877_v47 = vld [vmem:[%s2759_s15 + $0x48] sm:$0xff]  ;;  %v2880_v48 = vld [vmem:[%s2759_s15 + $0x50] sm:$0xff]  ;;  %v455_v52 = vld [vmem:[%s2759_s15 + $0x58] sm:$0x3] }
 0x106   : > { %630 = vrot.lane.b32.xlu1 %v592_v12, %s2367_s8  ;;  %541 = vrot.lane.b32.xlu0 %v503_v13, %s2368_s16  ;;  %v511_v36 = vsel %vm498_vm1, %v509_v32, %v510_v33  ;;  %v599_v41 = vrot.slane %v2845_v28, 2  ;;  %v512_v42 = vrot.slane %v452_v38, 1  ;;  %v601_v45 = vrot.slane %v452_v38, 2  ;;  %v2912_v60 = vld [vmem:[%s2759_s15 + $0x60] sm:$0xff]  ;;  %v2915_v61 = vld [vmem:[%s2759_s15 + $0x68] sm:$0xff]  ;;  %s3648_s0 = sld [smem:[#allocation35_spill]] }
 0x107   : > { %1792 = vmatpush3.bf16.msra.mxu0 %v1789_v31  ;;  %1800 = vmatpush3.bf16.msra.mxu1 %v1789_v31  ;;  %v514_v49 = vrot.slane %v2877_v47, 1  ;;  %v515_v50 = vrot.slane %v2880_v48, 1  ;;  %v603_v53 = vrot.slane %v2877_v47, 2  ;;  %v604_v54 = vrot.slane %v2880_v48, 2  ;;  %v458_v3 = vld [vmem:[%s2759_s15 + $0x70] sm:$0x3] }
 0x108   : > { %1794 = vmatprep.subr.bf16.mxu0 %v1793_v37  ;;  %1798 = vmatprep.subr.bf16.mxu1 %v1793_v37  ;;  %v600_v43 = vsel %vm587_vm0, %v598_v40, %v599_v41  ;;  %v513_v44 = vsel %vm498_vm1, %v510_v33, %v512_v42  ;;  %v602_v46 = vsel %vm587_vm0, %v599_v41, %v601_v45  ;;  %v517_v55 = vrot.slane %v455_v52, 1  ;;  %v2947_v13 = vld [vmem:[%s2759_s15 + $0x78] sm:$0xff]  ;;  %v2954_v18 = vld [vmem:[%s2759_s15 + $0x80] sm:$0xff]  ;;  %s1436_s6 = sshll.u32 %s2788_s30, 4  ;;  %s3369_s6 = int_to_ptr.vmem [resolvable:$true] %s1436_s6 }
 0x109   : > { %v516_v51 = vsel %vm498_vm1, %v514_v49, %v515_v50  ;;  %v605_v56 = vsel %vm587_vm0, %v603_v53, %v604_v54  ;;  %v606_v58 = vrot.slane %v455_v52, 2  ;;  %v519_v62 = vrot.slane %v2912_v60, 1  ;;  %v3009_v53 = vld [vmem:[%s2759_s15 + $0x98] sm:$0xff] }
 0x10a   : > { %680 = vrot.lane.b32.xlu1 %v2815_v14, %s2369_s24  ;;  %678 = vrot.lane.b32.xlu0 %v2818_v15, %s2369_s24  ;;  %v518_v57 = vsel %vm498_vm1, %v515_v50, %v517_v55  ;;  %v520_v63 = vrot.slane %v2915_v61, 1  ;;  %v608_v4 = vrot.slane %v2912_v60, 2  ;;  %v609_v5 = vrot.slane %v2915_v61, 2  ;;  %v3001_v50 = vld [vmem:[%s2759_s15 + $0x90] sm:$0xff] }
 0x10b   : > { %1796 = vmatpush3.bf16.msra.mxu0 %v1793_v37  ;;  %1801 = vmatpush3.bf16.msra.mxu1 %v1793_v37  ;;  %v607_v59 = vsel %vm587_vm0, %v604_v54, %v606_v58  ;;  %v522_v6 = vrot.slane %v458_v3, 1  ;;  %v611_v9 = vrot.slane %v458_v3, 2  ;;  %v525_v20 = vrot.slane %v2954_v18, 1 }
 0x10c   : > { %1763 = vmatprep.subr.msk.mxu0 %vm1180_vm2, %v1130_v39  ;;  %1799 = vmatprep.subr.msk.mxu1 %vm1180_vm2, %v1130_v39  ;;  %v521_v0 = vsel %vm498_vm1, %v519_v62, %v520_v63  ;;  %v610_v7 = vsel %vm587_vm0, %v608_v4, %v609_v5  ;;  %v613_v29 = vrot.slane %v2947_v13, 2  ;;  %v614_v30 = vrot.slane %v2954_v18, 2  ;;  %p3651_p5 = scmp.ne.s32.totalorder %s3648_s0, 0 }
 0x10d   : > { %v523_v8 = vsel %vm498_vm1, %v520_v63, %v522_v6  ;;  %v612_v10 = vsel %vm587_vm0, %v609_v5, %v611_v9  ;;  %vm990_vm3 = vcmask 31744   ;;  %vm1007_vm4 = vcmask 64512  }
 0x10e   : > { %543 = vrot.lane.b32.xlu1 %v506_v19, %s2368_s16  ;;  %732 = vrot.lane.b32.xlu0 %v506_v19, %s2370_s22  ;;  %v524_v19 = vrot.slane %v2947_v13, 1  ;;  %v615_v34 = vsel %vm587_vm0, %v613_v29, %v614_v30  ;;  %vm1024_vm5 = vcmask 97280   ;;  %vm1041_vm6 = vcmask 130048  }
 0x10f   : > { %1764 = vmatpush3.msk.msra.mxu0 %vm1180_vm2, %v1130_v39  ;;  %1802 = vmatpush3.msk.msra.mxu1 %vm1180_vm2, %v1130_v39  ;;  %vm1058_vm7 = vcmask 162816   ;;  %vm1075_vm8 = vcmask 195584   ;;  %vm1092_vm9 = vcmask 228352   ;;  %vm1109_vm10 = vcmask 261120  }
 0x110   : > { %v530_v58 = vrot.slane %v3009_v53, 1  ;;  %vm1131_vm11 = vcmask 293888  }
 0x112   : > { %785 = vrot.lane.b32.xlu1 %v595_v23, %s2371_s25  ;;  %734 = vrot.lane.b32.xlu0 %v508_v24, %s2370_s22 }
 0x116   : > { %632 = vrot.lane.b32.xlu1 %v595_v23, %s2367_s8  ;;  %545 = vrot.lane.b32.xlu0 %v508_v24, %s2368_s16  ;;  %v526_v23 = vsel %vm498_vm1, %v524_v19, %v525_v20 }
 0x11a   : > { %835 = vrot.lane.b32.xlu1 %v2841_v26, %s2372_s11  ;;  %787 = vrot.lane.b32.xlu0 %v597_v27, %s2371_s25 }
 0x11e   : > { %682 = vrot.lane.b32.xlu1 %v2841_v26, %s2369_s24  ;;  %634 = vrot.lane.b32.xlu0 %v597_v27, %s2367_s8  ;;  %v461_v27 = vld [vmem:[%s2759_s15 + $0x88] sm:$0x3] }
 0x11f   : > { %v527_v31 = vrot.slane %v461_v27, 1  ;;  %v616_v38 = vrot.slane %v461_v27, 2 }
 0x121   : > { %v528_v35 = vsel %vm498_vm1, %v525_v20, %v527_v31  ;;  %v617_v41 = vsel %vm587_vm0, %v614_v30, %v616_v38 }
 0x122   : > { %889 = vrot.lane.b32.xlu1 %v511_v36, %s2373_s18  ;;  %837 = vrot.lane.b32.xlu0 %v2845_v28, %s2372_s11 }
 0x126   : > { %736 = vrot.lane.b32.xlu1 %v511_v36, %s2370_s22  ;;  %684 = vrot.lane.b32.xlu0 %v2845_v28, %s2369_s24 }
 0x12a   : > { %942 = vrot.lane.b32.xlu1 %v600_v43, %s2374_s1  ;;  %891 = vrot.lane.b32.xlu0 %v513_v44, %s2373_s18 }
 0x12e   : > { %738 = vrot.lane.b32.xlu1 %v513_v44, %s2370_s22  ;;  %547 = vrot.lane.b32.xlu0 %v511_v36, %s2368_s16 }
 0x132   : > { %944 = vrot.lane.b32.xlu1 %v602_v46, %s2374_s1  ;;  %789 = vrot.lane.b32.xlu0 %v600_v43, %s2371_s25 }
 0x136   : > { %636 = vrot.lane.b32.xlu1 %v600_v43, %s2367_s8  ;;  %549 = vrot.lane.b32.xlu0 %v513_v44, %s2368_s16 }
 0x13a   : > { %839 = vrot.lane.b32.xlu1 %v2877_v47, %s2372_s11  ;;  %791 = vrot.lane.b32.xlu0 %v602_v46, %s2371_s25 }
 0x13e   : > { %686 = vrot.lane.b32.xlu1 %v2877_v47, %s2369_s24  ;;  %638 = vrot.lane.b32.xlu0 %v602_v46, %s2367_s8 }
 0x142   : > { %893 = vrot.lane.b32.xlu1 %v516_v51, %s2373_s18  ;;  %841 = vrot.lane.b32.xlu0 %v2880_v48, %s2372_s11 }
 0x146   : > { %740 = vrot.lane.b32.xlu1 %v516_v51, %s2370_s22  ;;  %688 = vrot.lane.b32.xlu0 %v2880_v48, %s2369_s24 }
 0x14a   : > { %946 = vrot.lane.b32.xlu1 %v605_v56, %s2374_s1  ;;  %895 = vrot.lane.b32.xlu0 %v518_v57, %s2373_s18 }
 0x14e   : > { %742 = vrot.lane.b32.xlu1 %v518_v57, %s2370_s22  ;;  %551 = vrot.lane.b32.xlu0 %v516_v51, %s2368_s16 }
 0x152   : > { %948 = vrot.lane.b32.xlu1 %v607_v59, %s2374_s1  ;;  %793 = vrot.lane.b32.xlu0 %v605_v56, %s2371_s25 }
 0x156   : > { %640 = vrot.lane.b32.xlu1 %v605_v56, %s2367_s8  ;;  %553 = vrot.lane.b32.xlu0 %v518_v57, %s2368_s16  ;;  %v529_v57 = vrot.slane %v3001_v50, 1 }
 0x158   : > { %v531_v5 = vsel %vm498_vm1, %v529_v57, %v530_v58 }
 0x15a   : > { %843 = vrot.lane.b32.xlu1 %v2912_v60, %s2372_s11  ;;  %795 = vrot.lane.b32.xlu0 %v607_v59, %s2371_s25 }
 0x15e   : > { %690 = vrot.lane.b32.xlu1 %v2912_v60, %s2369_s24  ;;  %642 = vrot.lane.b32.xlu0 %v607_v59, %s2367_s8 }
 0x162   : > { %897 = vrot.lane.b32.xlu1 %v521_v0, %s2373_s18  ;;  %845 = vrot.lane.b32.xlu0 %v2915_v61, %s2372_s11 }
 0x166   : > { %744 = vrot.lane.b32.xlu1 %v521_v0, %s2370_s22  ;;  %692 = vrot.lane.b32.xlu0 %v2915_v61, %s2369_s24 }
 0x16a   : > { %950 = vrot.lane.b32.xlu1 %v610_v7, %s2374_s1  ;;  %899 = vrot.lane.b32.xlu0 %v523_v8, %s2373_s18 }
 0x16e   : > { %746 = vrot.lane.b32.xlu1 %v523_v8, %s2370_s22  ;;  %555 = vrot.lane.b32.xlu0 %v521_v0, %s2368_s16 }
 0x172   : > { %952 = vrot.lane.b32.xlu1 %v612_v10, %s2374_s1  ;;  %797 = vrot.lane.b32.xlu0 %v610_v7, %s2371_s25 }
 0x174   : > { %v629_v11 = vpop.permute.xlu1 %628  ;;  %v540_v12 = vpop.permute.xlu0 %539 }
 0x175   : > { %v991_v44 = vsel %vm990_vm3, %v2798_v1, %v540_v12  ;;  %v618_v12 = vrot.slane %v3001_v50, 2 }
 0x176   : > { %644 = vrot.lane.b32.xlu1 %v610_v7, %s2367_s8  ;;  %557 = vrot.lane.b32.xlu0 %v523_v8, %s2368_s16  ;;  %v1008_v49 = vsel %vm1007_vm4, %v991_v44, %v629_v11  ;;  %v464_v8 = vld [vmem:[%s2759_s15 + $0xa0] sm:$0x3]  ;;  %v3077_v44 = vld [vmem:[%s2759_s15 + $0xa8] sm:$0xff] }
 0x177   : > { %v621_v30 = vrot.slane %v464_v8, 2 }
 0x178   : > { %v2949_v16 = vpop.permute.xlu1 %630  ;;  %v2951_v17 = vpop.permute.xlu0 %541 }
 0x179   : > { %v992_v59 = vsel %vm990_vm3, %v2801_v2, %v2951_v17  ;;  %v532_v17 = vrot.slane %v464_v8, 1 }
 0x17a   : > { %847 = vrot.lane.b32.xlu1 %v2947_v13, %s2372_s11  ;;  %799 = vrot.lane.b32.xlu0 %v612_v10, %s2371_s25  ;;  %v1009_v4 = vsel %vm1007_vm4, %v992_v59, %v2949_v16  ;;  %v619_v16 = vrot.slane %v3009_v53, 2 }
 0x17c   : > { %v2961_v21 = vpop.permute.xlu1 %680  ;;  %v679_v22 = vpop.permute.xlu0 %678 }
 0x17d   : > { %v1025_v51 = vsel %vm1024_vm5, %v1008_v49, %v679_v22  ;;  %v1026_v2 = vsel %vm1024_vm5, %v1009_v4, %v2961_v21 }
 0x17e   : > { %694 = vrot.lane.b32.xlu1 %v2947_v13, %s2369_s24  ;;  %646 = vrot.lane.b32.xlu0 %v612_v10, %s2367_s8 }
 0x180   : > { %v2967_v24 = vpop.permute.xlu1 %543  ;;  %v733_v25 = vpop.permute.xlu0 %732 }
 0x181   : > { %v1042_v54 = vsel %vm1041_vm6, %v1025_v51, %v733_v25  ;;  %v533_v25 = vsel %vm498_vm1, %v530_v58, %v532_v17  ;;  %v3086_v51 = vld [vmem:[%s2759_s15 + $0xb0] sm:$0xff] }
 0x182   : > { %901 = vrot.lane.b32.xlu1 %v526_v23, %s2373_s18  ;;  %849 = vrot.lane.b32.xlu0 %v2954_v18, %s2372_s11 }
 0x184   : > { %v786_v32 = vpop.permute.xlu1 %785  ;;  %v735_v33 = vpop.permute.xlu0 %734 }
 0x185   : > { %v1059_v55 = vsel %vm1058_vm7, %v1042_v54, %v786_v32  ;;  %v1043_v9 = vsel %vm1041_vm6, %v1026_v2, %v735_v33  ;;  %v622_v33 = vsel %vm587_vm0, %v619_v16, %v621_v30  ;;  %v535_v54 = vrot.slane %v3086_v51, 1 }
 0x186   : > { %748 = vrot.lane.b32.xlu1 %v526_v23, %s2370_s22  ;;  %696 = vrot.lane.b32.xlu0 %v2954_v18, %s2369_s24 }
 0x188   : > { %v2980_v36 = vpop.permute.xlu1 %632  ;;  %v2982_v37 = vpop.permute.xlu0 %545 }
 0x189   : > { %v994_v58 = vsel %vm990_vm3, %v2815_v14, %v2982_v37  ;;  %v467_v14 = vld [vmem:[%s2759_s15 + $0xb8] sm:$0x3]  ;;  %s3646_s15 = sld [smem:[#allocation25_spill]] }
 0x18a   : > { %954 = vrot.lane.b32.xlu1 %v615_v34, %s2374_s1  ;;  %903 = vrot.lane.b32.xlu0 %v528_v35, %s2373_s18  ;;  %v537_v2 = vrot.slane %v467_v14, 1 }
 0x18c   : > { %v836_v39 = vpop.permute.xlu1 %835  ;;  %v788_v40 = vpop.permute.xlu0 %787 }
 0x18d   : > { %v1076_v56 = vsel %vm1075_vm8, %v1059_v55, %v836_v39  ;;  %v1060_v10 = vsel %vm1058_vm7, %v1043_v9, %v788_v40  ;;  %v993_v40 = vsel %vm990_vm3, %v2818_v15, %v2967_v24 }
 0x18e   : > { %750 = vrot.lane.b32.xlu1 %v528_v35, %s2370_s22  ;;  %559 = vrot.lane.b32.xlu0 %v526_v23, %s2368_s16  ;;  %v620_v23 = vsel %vm587_vm0, %v618_v12, %v619_v16  ;;  %v538_v12 = vsel %vm498_vm1, %v535_v54, %v537_v2 }
 0x18f   : > { %s1733_s21 = sshll.u32 %s3646_s15, 4 }
 0x190   : > { %v2989_v42 = vpop.permute.xlu1 %682  ;;  %v2991_v43 = vpop.permute.xlu0 %634 }
 0x191   : > { %v1011_v59 = vsel %vm1007_vm4, %v994_v58, %v2991_v43 }
 0x192   : > { %956 = vrot.lane.b32.xlu1 %v617_v41, %s2374_s1  ;;  %801 = vrot.lane.b32.xlu0 %v615_v34, %s2371_s25 }
 0x194   : > { %v890_v45 = vpop.permute.xlu1 %889  ;;  %v838_v46 = vpop.permute.xlu0 %837 }
 0x195   : > { %v1093_v62 = vsel %vm1092_vm9, %v1076_v56, %v890_v45  ;;  %v1077_v11 = vsel %vm1075_vm8, %v1060_v10, %v838_v46 }
 0x196   : > { %648 = vrot.lane.b32.xlu1 %v615_v34, %s2367_s8  ;;  %561 = vrot.lane.b32.xlu0 %v528_v35, %s2368_s16 }
 0x198   : > { %v3004_v52 = vpop.permute.xlu1 %736  ;;  %v3006_v1 = vpop.permute.xlu0 %684 }
 0x19a   : > { %851 = vrot.lane.b32.xlu1 %v3001_v50, %s2372_s11  ;;  %803 = vrot.lane.b32.xlu0 %v617_v41, %s2371_s25 }
 0x19c   : > { %v943_v63 = vpop.permute.xlu1 %942  ;;  %v892_v0 = vpop.permute.xlu0 %891 }
 0x19d   : > { %v1110_v3 = vsel %vm1109_vm10, %v1093_v62, %v943_v63  ;;  %v1094_v19 = vsel %vm1092_vm9, %v1077_v11, %v892_v0  ;;  %v1028_v63 = vsel %vm1024_vm5, %v1011_v59, %v3006_v1  ;;  %v624_v1 = vrot.slane %v3086_v51, 2  ;;  %v470_v59 = vld [vmem:[%s2769_s2 + $0x10] sm:$0x3] }
 0x19e   : > { %698 = vrot.lane.b32.xlu1 %v3001_v50, %s2369_s24  ;;  %650 = vrot.lane.b32.xlu0 %v617_v41, %s2367_s8  ;;  %v1010_v41 = vsel %vm1007_vm4, %v993_v40, %v2980_v36 }
 0x19f   : > { %1765 = vmatprep.mubr.msk.f32.mxu0 %vm1131_vm11, %v1110_v3  ;;  %v1027_v45 = vsel %vm1024_vm5, %v1010_v41, %v2989_v42  ;;  %v534_v42 = vrot.slane %v3077_v44, 1 }
 0x1a0   : > { %v3033_v6 = vpop.permute.xlu1 %738  ;;  %v3035_v7 = vpop.permute.xlu0 %547  ;;  %v1044_v15 = vsel %vm1041_vm6, %v1027_v45, %v3004_v52  ;;  %v469_v45 = vld [vmem:[%s2769_s2 + $0x8] sm:$0xff] }
 0x1a1   : > { %v536_v62 = vsel %vm498_vm1, %v534_v42, %v535_v54  ;;  %v1045_v37 = vsel %vm1041_vm6, %v1028_v63, %v3033_v6  ;;  %v781_v63 = vrot.slane %v469_v45, 2 }
 0x1a2   : > { %905 = vrot.lane.b32.xlu1 %v531_v5, %s2373_s18  ;;  %853 = vrot.lane.b32.xlu0 %v3009_v53, %s2372_s11 }
 0x1a4   : > { %v945_v20 = vpop.permute.xlu1 %944  ;;  %v790_v21 = vpop.permute.xlu0 %789 }
 0x1a5   : > { %v1111_v22 = vsel %vm1109_vm10, %v1094_v19, %v945_v20  ;;  %v1061_v24 = vsel %vm1058_vm7, %v1044_v15, %v790_v21  ;;  %v626_v19 = vrot.slane %v467_v14, 2  ;;  %v730_v14 = vrot.slane %v470_v59, 1 }
 0x1a6   : > { %752 = vrot.lane.b32.xlu1 %v531_v5, %s2370_s22  ;;  %700 = vrot.lane.b32.xlu0 %v3009_v53, %s2369_s24 }
 0x1a7   : > { %1766 = vmatmul.mubr.msk.f32.vlgmr.msra.gmra.mrb[0].mxu0 %vm1131_vm11, %v1111_v22  ;;  %v627_v22 = vsel %vm587_vm0, %v624_v1, %v626_v19  ;;  %v472_v19 = vld [vmem:[%s2776_s27 + $0x8] sm:$0xff] }
 0x1a8   : > { %v3054_v27 = vpop.permute.xlu1 %636  ;;  %v3056_v29 = vpop.permute.xlu0 %549 }
 0x1aa   : > { %958 = vrot.lane.b32.xlu1 %v620_v23, %s2374_s1  ;;  %907 = vrot.lane.b32.xlu0 %v533_v25, %s2373_s18 }
 0x1ac   : > { %v840_v31 = vpop.permute.xlu1 %839  ;;  %v792_v32 = vpop.permute.xlu0 %791 }
 0x1ad   : > { %v1078_v36 = vsel %vm1075_vm8, %v1061_v24, %v840_v31  ;;  %v1062_v4 = vsel %vm1058_vm7, %v1045_v37, %v792_v32  ;;  %v995_v32 = vsel %vm990_vm3, %v2841_v26, %v3035_v7  ;;  %v728_v24 = vrot.slane %v469_v45, 1 }
 0x1ae   : > { %754 = vrot.lane.b32.xlu1 %v533_v25, %s2370_s22  ;;  %563 = vrot.lane.b32.xlu0 %v531_v5, %s2368_s16  ;;  %v623_v5 = vrot.slane %v3077_v44, 2 }
 0x1b0   : > { %v3063_v34 = vpop.permute.xlu1 %686  ;;  %v3065_v35 = vpop.permute.xlu0 %638  ;;  %v625_v11 = vsel %vm587_vm0, %v623_v5, %v624_v1  ;;  %v731_v5 = vsel %vm498_vm1, %v728_v24, %v730_v14 }
 0x1b2   : > { %960 = vrot.lane.b32.xlu1 %v622_v33, %s2374_s1  ;;  %805 = vrot.lane.b32.xlu0 %v620_v23, %s2371_s25 }
 0x1b4   : > { %v894_v38 = vpop.permute.xlu1 %893  ;;  %v842_v39 = vpop.permute.xlu0 %841 }
 0x1b5   : > { %v1095_v55 = vsel %vm1092_vm9, %v1078_v36, %v894_v38  ;;  %v1079_v43 = vsel %vm1075_vm8, %v1062_v4, %v842_v39  ;;  %v468_v38 = vld [vmem:[%s2769_s2] sm:$0xff]  ;;  %s3647_s2 = sld [smem:[#allocation26_spill]] }
 0x1b6   : > { %652 = vrot.lane.b32.xlu1 %v620_v23, %s2367_s8  ;;  %565 = vrot.lane.b32.xlu0 %v533_v25, %s2368_s16 }
 0x1b8   : > { %v3081_v46 = vpop.permute.xlu1 %740  ;;  %v3083_v49 = vpop.permute.xlu0 %688 }
 0x1ba   : > { %855 = vrot.lane.b32.xlu1 %v3077_v44, %s2372_s11  ;;  %807 = vrot.lane.b32.xlu0 %v622_v33, %s2371_s25 }
 0x1bc   : > { %v947_v56 = vpop.permute.xlu1 %946  ;;  %v896_v57 = vpop.permute.xlu0 %895 }
 0x1bd   : > { %v1112_v52 = vsel %vm1109_vm10, %v1095_v55, %v947_v56  ;;  %v1096_v8 = vsel %vm1092_vm9, %v1079_v43, %v896_v57 }
 0x1be   : > { %702 = vrot.lane.b32.xlu1 %v3077_v44, %s2369_s24  ;;  %654 = vrot.lane.b32.xlu0 %v622_v33, %s2367_s8  ;;  %v1012_v33 = vsel %vm1007_vm4, %v995_v32, %v3054_v27  ;;  %v727_v27 = vrot.slane %v468_v38, 1 }
 0x1bf   : > { %1768 = vmatprep.mubr.msk.f32.mxu0 %vm1131_vm11, %v1112_v52  ;;  %v1029_v39 = vsel %vm1024_vm5, %v1012_v33, %v3063_v34 }
 0x1c0   : > { %v3111_v0 = vpop.permute.xlu1 %742  ;;  %v3113_v3 = vpop.permute.xlu0 %551  ;;  %v1046_v15 = vsel %vm1041_vm6, %v1029_v39, %v3081_v46  ;;  %v996_v46 = vsel %vm990_vm3, %v2845_v28, %v3056_v29  ;;  %v729_v56 = vsel %vm498_vm1, %v727_v27, %v728_v24  ;;  %v938_v39 = vrot.slane %v472_v19, 2 }
 0x1c1   : > { %v1013_v55 = vsel %vm1007_vm4, %v996_v46, %v3065_v35 }
 0x1c2   : > { %909 = vrot.lane.b32.xlu1 %v536_v62, %s2373_s18  ;;  %857 = vrot.lane.b32.xlu0 %v3086_v51, %s2372_s11  ;;  %v1030_v57 = vsel %vm1024_vm5, %v1013_v55, %v3083_v49 }
 0x1c3   : > { %v1047_v28 = vsel %vm1041_vm6, %v1030_v57, %v3111_v0 }
 0x1c4   : > { %v949_v9 = vpop.permute.xlu1 %948  ;;  %v794_v10 = vpop.permute.xlu0 %793 }
 0x1c5   : > { %v1113_v6 = vsel %vm1109_vm10, %v1096_v8, %v949_v9  ;;  %v1063_v26 = vsel %vm1058_vm7, %v1046_v15, %v794_v10  ;;  %v783_v8 = vrot.slane %v470_v59, 2 }
 0x1c6   : > { %756 = vrot.lane.b32.xlu1 %v536_v62, %s2370_s22  ;;  %704 = vrot.lane.b32.xlu0 %v3086_v51, %s2369_s24 }
 0x1c7   : > { %1769 = vmatmul.mubr.msk.f32.gmra.mrb[2].mxu0 %vm1131_vm11, %v1113_v6  ;;  %v784_v6 = vsel %vm587_vm0, %v781_v63, %v783_v8 }
 0x1c8   : > { %v3133_v16 = vpop.permute.xlu1 %640  ;;  %v3135_v17 = vpop.permute.xlu0 %553 }
 0x1ca   : > { %962 = vrot.lane.b32.xlu1 %v625_v11, %s2374_s1  ;;  %911 = vrot.lane.b32.xlu0 %v538_v12, %s2373_s18 }
 0x1cc   : > { %v844_v20 = vpop.permute.xlu1 %843  ;;  %v796_v21 = vpop.permute.xlu0 %795 }
 0x1cd   : > { %v1080_v7 = vsel %vm1075_vm8, %v1063_v26, %v844_v20  ;;  %v1064_v29 = vsel %vm1058_vm7, %v1047_v28, %v796_v21  ;;  %v471_v20 = vld [vmem:[%s2776_s27] sm:$0xff]  ;;  %v473_v21 = vld [vmem:[%s2776_s27 + $0x10] sm:$0x3]  ;;  %s1727_s27 = sshll.u32 %s3647_s2, 5 }
 0x1ce   : > { %758 = vrot.lane.b32.xlu1 %v538_v12, %s2370_s22  ;;  %567 = vrot.lane.b32.xlu0 %v536_v62, %s2368_s16  ;;  %v780_v62 = vrot.slane %v468_v38, 2  ;;  %v940_v27 = vrot.slane %v473_v21, 2  ;;  %s1433_s23 = sadd.s32 %s1733_s21, %s1727_s27 }
 0x1cf   : > { %s1728_s10 = sshll.u32 %s1433_s23, 7 }
 0x1d0   : > { %v3142_v23 = vpop.permute.xlu1 %690  ;;  %v3144_v25 = vpop.permute.xlu0 %642  ;;  %v782_v0 = vsel %vm587_vm0, %v780_v62, %v781_v63 }
 0x1d2   : > { %964 = vrot.lane.b32.xlu1 %v627_v22, %s2374_s1  ;;  %809 = vrot.lane.b32.xlu0 %v625_v11, %s2371_s25 }
 0x1d4   : > { %v898_v30 = vpop.permute.xlu1 %897  ;;  %v846_v31 = vpop.permute.xlu0 %845 }
 0x1d5   : > { %v1097_v34 = vsel %vm1092_vm9, %v1080_v7, %v898_v30  ;;  %v1081_v35 = vsel %vm1075_vm8, %v1064_v29, %v846_v31  ;;  %v884_v30 = vrot.slane %v471_v20, 1  ;;  %v887_v31 = vrot.slane %v473_v21, 1 }
 0x1d6   : > { %656 = vrot.lane.b32.xlu1 %v625_v11, %s2367_s8  ;;  %569 = vrot.lane.b32.xlu0 %v538_v12, %s2368_s16 }
 0x1d8   : > { %v3158_v40 = vpop.permute.xlu1 %744  ;;  %v3160_v41 = vpop.permute.xlu0 %692 }
 0x1da   : > { %859 = vrot.lane.b32.xlu1 %v468_v38, %s2372_s11  ;;  %811 = vrot.lane.b32.xlu0 %v627_v22, %s2371_s25 }
 0x1dc   : > { %v951_v36 = vpop.permute.xlu1 %950  ;;  %v900_v42 = vpop.permute.xlu0 %899 }
 0x1dd   : > { %v1114_v54 = vsel %vm1109_vm10, %v1097_v34, %v951_v36  ;;  %v1098_v49 = vsel %vm1092_vm9, %v1081_v35, %v900_v42  ;;  %v941_v42 = vsel %vm587_vm0, %v938_v39, %v940_v27 }
 0x1de   : > { %706 = vrot.lane.b32.xlu1 %v468_v38, %s2369_s24  ;;  %658 = vrot.lane.b32.xlu0 %v627_v22, %s2367_s8  ;;  %v885_v22 = vrot.slane %v472_v19, 1  ;;  %v997_v38 = vsel %vm990_vm3, %v2877_v47, %v3113_v3 }
 0x1df   : > { %1771 = vmatprep.mubr.msk.f32.mxu0 %vm1131_vm11, %v1114_v54  ;;  %v1014_v15 = vsel %vm1007_vm4, %v997_v38, %v3133_v16 }
 0x1e0   : > { %v3182_v52 = vpop.permute.xlu1 %746  ;;  %v3184_v58 = vpop.permute.xlu0 %555  ;;  %v888_v26 = vsel %vm498_vm1, %v885_v22, %v887_v31  ;;  %v886_v7 = vsel %vm498_vm1, %v884_v30, %v885_v22  ;;  %v1031_v24 = vsel %vm1024_vm5, %v1014_v15, %v3142_v23 }
 0x1e1   : > { %v1048_v47 = vsel %vm1041_vm6, %v1031_v24, %v3158_v40  ;;  %v998_v40 = vsel %vm990_vm3, %v2880_v48, %v3135_v17  ;;  %v999_v8 = vsel %vm990_vm3, %v2912_v60, %v3184_v58 }
 0x1e2   : > { %913 = vrot.lane.b32.xlu1 %v729_v56, %s2373_s18  ;;  %861 = vrot.lane.b32.xlu0 %v469_v45, %s2372_s11  ;;  %v1015_v57 = vsel %vm1007_vm4, %v998_v40, %v3144_v25 }
 0x1e3   : > { %v1032_v59 = vsel %vm1024_vm5, %v1015_v57, %v3160_v41 }
 0x1e4   : > { %v953_v37 = vpop.permute.xlu1 %952  ;;  %v798_v4 = vpop.permute.xlu0 %797  ;;  %v1049_v35 = vsel %vm1041_vm6, %v1032_v59, %v3182_v52 }
 0x1e5   : > { %v1115_v43 = vsel %vm1109_vm10, %v1098_v49, %v953_v37  ;;  %v1065_v3 = vsel %vm1058_vm7, %v1048_v47, %v798_v4 }
 0x1e6   : > { %760 = vrot.lane.b32.xlu1 %v729_v56, %s2370_s22  ;;  %708 = vrot.lane.b32.xlu0 %v469_v45, %s2369_s24  ;;  %v937_v45 = vrot.slane %v471_v20, 2  ;;  %s3649_s24 = sld [smem:[#allocation44_spill]] }
 0x1e7   : > { %1772 = vmatmul.mubr.msk.f32.gmra.mrb[4].mxu0 %vm1131_vm11, %v1115_v43 }
 0x1e8   : > { %v3200_v1 = vpop.permute.xlu1 %644  ;;  %v3202_v2 = vpop.permute.xlu0 %557  ;;  %v939_v54 = vsel %vm587_vm0, %v937_v45, %v938_v39 }
 0x1e9   : > { %v1000_v60 = vsel %vm990_vm3, %v2915_v61, %v3202_v2 }
 0x1ea   : > { %966 = vrot.lane.b32.xlu1 %v782_v0, %s2374_s1  ;;  %915 = vrot.lane.b32.xlu0 %v731_v5, %s2373_s18 }
 0x1ec   : > { %v848_v9 = vpop.permute.xlu1 %847  ;;  %v800_v10 = vpop.permute.xlu0 %799 }
 0x1ed   : > { %v1082_v16 = vsel %vm1075_vm8, %v1065_v3, %v848_v9  ;;  %v1066_v62 = vsel %vm1058_vm7, %v1049_v35, %v800_v10  ;;  %v1016_v9 = vsel %vm1007_vm4, %v999_v8, %v3200_v1 }
 0x1ee   : > { %813 = vrot.lane.b32.xlu1 %v782_v0, %s2371_s25  ;;  %762 = vrot.lane.b32.xlu0 %v731_v5, %s2370_s22  ;;  %s3374_s22 = scalar_lea.hbm %s3649_s24, %s1728_s10 }
 0x1f0   : > { %v695_v11 = vpop.permute.xlu1 %694  ;;  %v3209_v12 = vpop.permute.xlu0 %646 }
 0x1f1   : > { %v1033_v10 = vsel %vm1024_vm5, %v1016_v9, %v695_v11  ;;  %v1017_v58 = vsel %vm1007_vm4, %v1000_v60, %v3209_v12 }
 0x1f2   : > { %815 = vrot.lane.b32.xlu1 %v784_v6, %s2371_s25  ;;  %968 = vrot.lane.b32.xlu0 %v784_v6, %s2374_s1  ;;  %s1410_s25 = scalar_lea.sflag [#allocation4], %s2755_s20 }
 0x1f4   : > { %v902_v32 = vpop.permute.xlu1 %901  ;;  %v850_v33 = vpop.permute.xlu0 %849 }
 0x1f5   : > { %v1099_v46 = vsel %vm1092_vm9, %v1082_v16, %v902_v32  ;;  %v1083_v48 = vsel %vm1075_vm8, %v1066_v62, %v850_v33 }
 0x1f6   : > { %865 = vrot.lane.b32.xlu1 %v472_v19, %s2372_s11  ;;  %863 = vrot.lane.b32.xlu0 %v471_v20, %s2372_s11  ;;  %s2110_s11 = scalar_lea.vmem %s3369_s6, 2048 }
 0x1f7   : > { %p2111_p11 = scmp.ne.s32.totalorder %s3369_s6, %s2110_s11 }
 0x1f8   : > { %v749_v34 = vpop.permute.xlu1 %748  ;;  %v697_v36 = vpop.permute.xlu0 %696 }
 0x1f9   : > { %v1050_v20 = vsel %vm1041_vm6, %v1033_v10, %v749_v34  ;;  %v1034_v1 = vsel %vm1024_vm5, %v1017_v58, %v697_v36  ;;  %p2112_p3 = pnand %p2111_p11, %p3651_p5 }
 0x1fa   : > { %919 = vrot.lane.b32.xlu1 %v888_v26, %s2373_s18  ;;  %917 = vrot.lane.b32.xlu0 %v886_v7, %s2373_s18  ;;  %s3650_s18 = smov %s3649_s24 }
 0x1fb   : > { %p2113_p12 = pneg %p2112_p3 }
 0x1fc   : > { %v955_v23 = vpop.permute.xlu1 %954  ;;  %v904_v55 = vpop.permute.xlu0 %903 }
 0x1fd   : > { %v1116_v56 = vsel %vm1109_vm10, %v1099_v46, %v955_v23  ;;  %v1100_v17 = vsel %vm1092_vm9, %v1083_v48, %v904_v55 }
 0x1fe   : > { %972 = vrot.lane.b32.xlu1 %v941_v42, %s2374_s1  ;;  %970 = vrot.lane.b32.xlu0 %v939_v54, %s2374_s1  ;;  %s2375_s1 = smov [#allocation10]  }
 0x1ff   : > { %1774 = vmatprep.mubr.msk.f32.mxu0 %vm1131_vm11, %v1116_v56  ;;  %s2114_s15 = sshll.u32 %s2375_s1, 4  ;;  %s2115_s15 = int_to_ptr.vmem [resolvable:$false] %s2114_s15 }
 0x200   : > { %v751_v28 = vpop.permute.xlu1 %750  ;;  %v560_v29 = vpop.permute.xlu0 %559  ;;  %s2116_s21 = scalar_lea.vmem %s2115_s15, 4096  ;;  %p2117_p7 = scmp.lt.s32.totalorder %s3369_s6, %s2115_s15 }
 0x201   : > { %v1051_v39 = vsel %vm1041_vm6, %v1034_v1, %v751_v28  ;;  %v1001_v42 = vsel %vm990_vm3, %v2947_v13, %v560_v29  ;;  %p2118_p10 = scmp.lt.s32.totalorder %s2116_s21, %s2110_s11 }
 0x203   : > { %p2119_p13 = por %p2118_p10, %p2117_p7 }
 0x204   : > { %v957_v63 = vpop.permute.xlu1 %956  ;;  %v802_v14 = vpop.permute.xlu0 %801 }
 0x205   : > { %v1117_v25 = vsel %vm1109_vm10, %v1100_v17, %v957_v63  ;;  %v1067_v21 = vsel %vm1058_vm7, %v1050_v20, %v802_v14  ;;  %p2120_p8 = pnand %p2119_p13, %p2113_p12 }
 0x206   : > { %1775 = vmatmul.mubr.msk.f32.gmra.mrb[6].mxu0 %vm1131_vm11, %v1117_v25 }
 0x208   : > { %v649_v49 = vpop.permute.xlu1 %648  ;;  %v562_v37 = vpop.permute.xlu0 %561 }
 0x209   : > { %v1018_v54 = vsel %vm1007_vm4, %v1001_v42, %v649_v49  ;;  %v1002_v13 = vsel %vm990_vm3, %v2954_v18, %v562_v37 }
 0x20c   : > { %v852_v41 = vpop.permute.xlu1 %851  ;;  %v804_v4 = vpop.permute.xlu0 %803 }
 0x20d   : > { %v1084_v22 = vsel %vm1075_vm8, %v1067_v21, %v852_v41  ;;  %v1068_v45 = vsel %vm1058_vm7, %v1051_v39, %v804_v4 }
 0x210   : > { %v699_v43 = vpop.permute.xlu1 %698  ;;  %v651_v0 = vpop.permute.xlu0 %650 }
 0x211   : > { %v1035_v46 = vsel %vm1024_vm5, %v1018_v54, %v699_v43  ;;  %v1019_v29 = vsel %vm1007_vm4, %v1002_v13, %v651_v0 }
 0x214   : > { %v906_v5 = vpop.permute.xlu1 %905  ;;  %v854_v52 = vpop.permute.xlu0 %853 }
 0x215   : > { %v1101_v30 = vsel %vm1092_vm9, %v1084_v22, %v906_v5  ;;  %v1085_v15 = vsel %vm1075_vm8, %v1068_v45, %v854_v52 }
 0x218   : > { %v753_v6 = vpop.permute.xlu1 %752  ;;  %v701_v19 = vpop.permute.xlu0 %700 }
 0x219   : > { %v1052_v56 = vsel %vm1041_vm6, %v1035_v46, %v753_v6  ;;  %v1036_v48 = vsel %vm1024_vm5, %v1019_v29, %v701_v19 }
 0x21c   : > { %v959_v31 = vpop.permute.xlu1 %958  ;;  %v908_v32 = vpop.permute.xlu0 %907 }
 0x21d   : > { %v1118_v33 = vsel %vm1109_vm10, %v1101_v30, %v959_v31  ;;  %v1102_v26 = vsel %vm1092_vm9, %v1085_v15, %v908_v32 }
 0x21e   : > { %1777 = vmatprep.mubr.msk.f32.mxu1 %vm1131_vm11, %v1118_v33 }
 0x220   : > { %v755_v11 = vpop.permute.xlu1 %754  ;;  %v564_v38 = vpop.permute.xlu0 %563 }
 0x221   : > { %v1053_v14 = vsel %vm1041_vm6, %v1036_v48, %v755_v11  ;;  %v1003_v19 = vsel %vm990_vm3, %v3001_v50, %v564_v38 }
 0x224   : > { %v961_v7 = vpop.permute.xlu1 %960  ;;  %v806_v27 = vpop.permute.xlu0 %805 }
 0x225   : > { %v1119_v61 = vsel %vm1109_vm10, %v1102_v26, %v961_v7  ;;  %v1069_v40 = vsel %vm1058_vm7, %v1052_v56, %v806_v27 }
 0x226   : > { %1778 = vmatmul.mubr.msk.f32.vlgmr.msra.gmra.mrb[0].mxu1 %vm1131_vm11, %v1119_v61 }
 0x228   : > { %v653_v2 = vpop.permute.xlu1 %652  ;;  %v566_v12 = vpop.permute.xlu0 %565 }
 0x229   : > { %v1020_v20 = vsel %vm1007_vm4, %v1003_v19, %v653_v2  ;;  %v1004_v50 = vsel %vm990_vm3, %v3009_v53, %v566_v12 }
 0x22c   : > { %v856_v24 = vpop.permute.xlu1 %855  ;;  %v808_v34 = vpop.permute.xlu0 %807 }
 0x22d   : > { %v1086_v57 = vsel %vm1075_vm8, %v1069_v40, %v856_v24  ;;  %v1070_v25 = vsel %vm1058_vm7, %v1053_v14, %v808_v34 }
 0x230   : > { %v703_v36 = vpop.permute.xlu1 %702  ;;  %v655_v47 = vpop.permute.xlu0 %654 }
 0x231   : > { %v1037_v21 = vsel %vm1024_vm5, %v1020_v20, %v703_v36  ;;  %v1021_v38 = vsel %vm1007_vm4, %v1004_v50, %v655_v47 }
 0x234   : > { %v910_v3 = vpop.permute.xlu1 %909  ;;  %v858_v16 = vpop.permute.xlu0 %857 }
 0x235   : > { %v1103_v59 = vsel %vm1092_vm9, %v1086_v57, %v910_v3  ;;  %v1087_v49 = vsel %vm1075_vm8, %v1070_v25, %v858_v16 }
 0x238   : > { %v757_v23 = vpop.permute.xlu1 %756  ;;  %v705_v55 = vpop.permute.xlu0 %704 }
 0x239   : > { %v1054_v31 = vsel %vm1041_vm6, %v1037_v21, %v757_v23  ;;  %v1038_v39 = vsel %vm1024_vm5, %v1021_v38, %v705_v55 }
 0x23c   : > { %v963_v28 = vpop.permute.xlu1 %962  ;;  %v912_v35 = vpop.permute.xlu0 %911 }
 0x23d   : > { %v1120_v62 = vsel %vm1109_vm10, %v1103_v59, %v963_v28  ;;  %v1104_v41 = vsel %vm1092_vm9, %v1087_v49, %v912_v35 }
 0x23e   : > { %1780 = vmatprep.mubr.msk.f32.mxu1 %vm1131_vm11, %v1120_v62 }
 0x240   : > { %v759_v17 = vpop.permute.xlu1 %758  ;;  %v568_v63 = vpop.permute.xlu0 %567 }
 0x241   : > { %v1055_v26 = vsel %vm1041_vm6, %v1038_v39, %v759_v17  ;;  %v1005_v36 = vsel %vm990_vm3, %v3077_v44, %v568_v63 }
 0x244   : > { %v965_v4 = vpop.permute.xlu1 %964  ;;  %v810_v43 = vpop.permute.xlu0 %809 }
 0x245   : > { %v1121_v18 = vsel %vm1109_vm10, %v1104_v41, %v965_v4  ;;  %v1071_v32 = vsel %vm1058_vm7, %v1054_v31, %v810_v43 }
 0x246   : > { %1781 = vmatmul.mubr.msk.f32.gmra.mrb[2].mxu1 %vm1131_vm11, %v1121_v18 }
 0x248   : > { %v657_v37 = vpop.permute.xlu1 %656  ;;  %v570_v0 = vpop.permute.xlu0 %569 }
 0x249   : > { %v1006_v47 = vsel %vm990_vm3, %v3086_v51, %v570_v0  ;;  %v1022_v3 = vsel %vm1007_vm4, %v1005_v36, %v657_v37 }
 0x24c   : > { %v860_v5 = vpop.permute.xlu1 %859  ;;  %v812_v52 = vpop.permute.xlu0 %811 }
 0x24d   : > { %v1088_v33 = vsel %vm1075_vm8, %v1071_v32, %v860_v5  ;;  %v1072_v7 = vsel %vm1058_vm7, %v1055_v26, %v812_v52 }
 0x250   : > { %v707_v8 = vpop.permute.xlu1 %706  ;;  %v659_v9 = vpop.permute.xlu0 %658 }
 0x251   : > { %v1023_v16 = vsel %vm1007_vm4, %v1006_v47, %v659_v9  ;;  %v1039_v42 = vsel %vm1024_vm5, %v1022_v3, %v707_v8 }
 0x254   : > { %v914_v10 = vpop.permute.xlu1 %913  ;;  %v862_v6 = vpop.permute.xlu0 %861 }
 0x255   : > { %v1105_v60 = vsel %vm1092_vm9, %v1088_v33, %v914_v10  ;;  %v1089_v27 = vsel %vm1075_vm8, %v1072_v7, %v862_v6 }
 0x258   : > { %v761_v22 = vpop.permute.xlu1 %760  ;;  %v709_v30 = vpop.permute.xlu0 %708 }
 0x259   : > { %v1040_v54 = vsel %vm1024_vm5, %v1023_v16, %v709_v30  ;;  %v1056_v55 = vsel %vm1041_vm6, %v1039_v42, %v761_v22 }
 0x25c   : > { %v967_v58 = vpop.permute.xlu1 %966  ;;  %v916_v1 = vpop.permute.xlu0 %915 }
 0x25d   : > { %v1122_v11 = vsel %vm1109_vm10, %v1105_v60, %v967_v58  ;;  %v1106_v61 = vsel %vm1092_vm9, %v1089_v27, %v916_v1 }
 0x25e   : > { %1783 = vmatprep.mubr.msk.f32.mxu1 %vm1131_vm11, %v1122_v11 }
 0x260   : > { %v814_v45 = vpop.permute.xlu1 %813  ;;  %v763_v15 = vpop.permute.xlu0 %762 }
 0x261   : > { %v1057_v56 = vsel %vm1041_vm6, %v1040_v54, %v763_v15  ;;  %v1073_v44 = vsel %vm1058_vm7, %v1056_v55, %v814_v45 }
 0x264   : > { %v816_v2 = vpop.permute.xlu1 %815  ;;  %v969_v24 = vpop.permute.xlu0 %968 }
 0x265   : > { %v1123_v53 = vsel %vm1109_vm10, %v1106_v61, %v969_v24  ;;  %v1074_v40 = vsel %vm1058_vm7, %v1057_v56, %v816_v2 }
 0x266   : > { %1784 = vmatmul.mubr.msk.f32.gmra.mrb[4].mxu1 %vm1131_vm11, %v1123_v53 }
 0x268   : > { %v866_v12 = vpop.permute.xlu1 %865  ;;  %v864_v34 = vpop.permute.xlu0 %863 }
 0x269   : > { %v1091_v51 = vsel %vm1075_vm8, %v1074_v40, %v866_v12  ;;  %v1090_v57 = vsel %vm1075_vm8, %v1073_v44, %v864_v34 }
 0x26c   : > { %v920_v46 = vpop.permute.xlu1 %919  ;;  %v918_v23 = vpop.permute.xlu0 %917 }
 0x26d   : > { %v1108_v59 = vsel %vm1092_vm9, %v1091_v51, %v920_v46  ;;  %v1107_v28 = vsel %vm1092_vm9, %v1090_v57, %v918_v23 }
 0x270   : > { %v973_v35 = vpop.permute.xlu1 %972  ;;  %v971_v62 = vpop.permute.xlu0 %970 }
 0x271   : > { %v1125_v13 = vsel %vm1109_vm10, %v1108_v59, %v973_v35  ;;  %v1124_v29 = vsel %vm1109_vm10, %v1107_v28, %v971_v62 }
 0x272   : > { %1786 = vmatprep.mubr.msk.f32.mxu1 %vm1131_vm11, %v1124_v29 }
 0x273   : > { %1787 = vmatmul.mubr.msk.f32.gmra.mrb[6].mxu1 %vm1131_vm11, %v1125_v13 }
 0x27a   : > { %v1767_v48 = vpop.f32.mrb[0].mxu0 }
 0x27b   : > { %v1355_v17 = vmul.f32 %v1767_v48, %v1767_v48  ;;  %1394 = vst.msk [vmem:[%s2788_s30 + $0x8] sm:$0xff] %vm1007_vm4, %v1767_v48  ;;  %v1250_v63 = vpop.f32.mrb[1].mxu0 }
 0x27c   : > { %v1330_v14 = vadd.f32 %v1767_v48, %v1250_v63  ;;  %v1354_v25 = vmul.f32 %v1250_v63, %v1250_v63  ;;  %1393 = vst.msk [vmem:[%s2788_s30] sm:$0xff] %vm1007_vm4, %v1250_v63 }
 0x27e   : > { %v1370_v49 = vadd.f32 %v1355_v17, %v1354_v25 }
 0x29a   : > { %v1770_v41 = vpop.f32.mrb[2].mxu0 }
 0x29b   : > { %1396 = vst.msk [vmem:[%s2788_s30 + $0x18] sm:$0xff] %vm1007_vm4, %v1770_v41  ;;  %v1260_v4 = vpop.f32.mrb[3].mxu0  ;;  %v1357_v37 = vmul.f32 %v1770_v41, %v1770_v41 }
 0x29c   : > { %v1331_v43 = vadd.f32 %v1330_v14, %v1260_v4  ;;  %v1356_v18 = vmul.f32 %v1260_v4, %v1260_v4  ;;  %1395 = vst.msk [vmem:[%s2788_s30 + $0x10] sm:$0xff] %vm1007_vm4, %v1260_v4 }
 0x29e   : > { %v1371_v0 = vadd.f32 %v1370_v49, %v1356_v18  ;;  %v1332_v5 = vadd.f32 %v1770_v41, %v1331_v43 }
 0x2a0   : > { %v1372_v52 = vadd.f32 %v1371_v0, %v1357_v37 }
 0x2ba   : > { %v1773_v8 = vpop.f32.mrb[4].mxu0 }
 0x2bb   : > { %1398 = vst.msk [vmem:[%s2788_s30 + $0x28] sm:$0xff] %vm1007_vm4, %v1773_v8  ;;  %v1270_v9 = vpop.f32.mrb[5].mxu0  ;;  %v1359_v19 = vmul.f32 %v1773_v8, %v1773_v8 }
 0x2bc   : > { %v1333_v10 = vadd.f32 %v1332_v5, %v1270_v9  ;;  %v1358_v6 = vmul.f32 %v1270_v9, %v1270_v9  ;;  %1397 = vst.msk [vmem:[%s2788_s30 + $0x20] sm:$0xff] %vm1007_vm4, %v1270_v9 }
 0x2be   : > { %v1373_v20 = vadd.f32 %v1372_v52, %v1358_v6  ;;  %v1334_v21 = vadd.f32 %v1773_v8, %v1333_v10 }
 0x2c0   : > { %v1374_v22 = vadd.f32 %v1373_v20, %v1359_v19 }
 0x2d9   : > { %v1776_v30 = vpop.f32.mrb[6].mxu0 }
 0x2da   : > { %1400 = vst.msk [vmem:[%s2788_s30 + $0x38] sm:$0xff] %vm1007_vm4, %v1776_v30  ;;  %v1280_v31 = vpop.f32.mrb[7].mxu0  ;;  %v1361_v60 = vmul.f32 %v1776_v30, %v1776_v30 }
 0x2db   : > { %v1335_v32 = vadd.f32 %v1334_v21, %v1280_v31  ;;  %v1360_v33 = vmul.f32 %v1280_v31, %v1280_v31  ;;  %1399 = vst.msk [vmem:[%s2788_s30 + $0x30] sm:$0xff] %vm1007_vm4, %v1280_v31 }
 0x2dd   : > { %v1336_v58 = vadd.f32 %v1776_v30, %v1335_v32  ;;  %v1375_v1 = vadd.f32 %v1374_v22, %v1360_v33 }
 0x2df   : > { %v1376_v11 = vadd.f32 %v1375_v1, %v1361_v60 }
 0x2f9   : > { %v1779_v50 = vpop.f32.mrb[0].mxu1 }
 0x2fa   : > { %1402 = vst.msk [vmem:[%s2788_s30 + $0x48] sm:$0xff] %vm1007_vm4, %v1779_v50  ;;  %v1290_v38 = vpop.f32.mrb[1].mxu1  ;;  %v1363_v15 = vmul.f32 %v1779_v50, %v1779_v50 }
 0x2fb   : > { %v1337_v39 = vadd.f32 %v1336_v58, %v1290_v38  ;;  %v1362_v45 = vmul.f32 %v1290_v38, %v1290_v38  ;;  %1401 = vst.msk [vmem:[%s2788_s30 + $0x40] sm:$0xff] %vm1007_vm4, %v1290_v38 }
 0x2fd   : > { %v1377_v26 = vadd.f32 %v1376_v11, %v1362_v45  ;;  %v1338_v7 = vadd.f32 %v1779_v50, %v1337_v39 }
 0x2ff   : > { %v1378_v27 = vadd.f32 %v1377_v26, %v1363_v15 }
 0x319   : > { %v1782_v61 = vpop.f32.mrb[2].mxu1 }
 0x31a   : > { %1404 = vst.msk [vmem:[%s2788_s30 + $0x58] sm:$0xff] %vm1007_vm4, %v1782_v61  ;;  %v1300_v2 = vpop.f32.mrb[3].mxu1  ;;  %v1365_v12 = vmul.f32 %v1782_v61, %v1782_v61 }
 0x31b   : > { %v1339_v24 = vadd.f32 %v1338_v7, %v1300_v2  ;;  %v1364_v53 = vmul.f32 %v1300_v2, %v1300_v2  ;;  %1403 = vst.msk [vmem:[%s2788_s30 + $0x50] sm:$0xff] %vm1007_vm4, %v1300_v2 }
 0x31d   : > { %v1379_v34 = vadd.f32 %v1378_v27, %v1364_v53  ;;  %v1340_v36 = vadd.f32 %v1782_v61, %v1339_v24 }
 0x31f   : > { %v1380_v47 = vadd.f32 %v1379_v34, %v1365_v12 }
 0x339   : > { %v1785_v3 = vpop.f32.mrb[4].mxu1 }
 0x33a   : > { %1406 = vst.msk [vmem:[%s2788_s30 + $0x68] sm:$0xff] %vm1007_vm4, %v1785_v3  ;;  %v1310_v16 = vpop.f32.mrb[5].mxu1  ;;  %v1367_v46 = vmul.f32 %v1785_v3, %v1785_v3 }
 0x33b   : > { %v1341_v42 = vadd.f32 %v1340_v36, %v1310_v16  ;;  %v1366_v54 = vmul.f32 %v1310_v16, %v1310_v16  ;;  %1405 = vst.msk [vmem:[%s2788_s30 + $0x60] sm:$0xff] %vm1007_vm4, %v1310_v16 }
 0x33d   : > { %v1381_v23 = vadd.f32 %v1380_v47, %v1366_v54  ;;  %v1342_v55 = vadd.f32 %v1785_v3, %v1341_v42 }
 0x33f   : > { %v1382_v56 = vadd.f32 %v1381_v23, %v1367_v46 }
 0x346   : > { %v1788_v44 = vpop.f32.mrb[6].mxu1 }
 0x347   : > { %1408 = vst.msk [vmem:[%s2788_s30 + $0x78] sm:$0xff] %vm1007_vm4, %v1788_v44  ;;  %v1320_v40 = vpop.f32.mrb[7].mxu1 }
 0x348   : > { %v1343_v51 = vadd.f32 %v1342_v55, %v1320_v40  ;;  %v1368_v57 = vmul.f32 %v1320_v40, %v1320_v40  ;;  %1407 = vst.msk [vmem:[%s2788_s30 + $0x70] sm:$0xff] %vm1007_vm4, %v1320_v40 }
 0x349   : > { %2123 = shalt.err (!%p2120_p8)
}
 0x34a   : > { %s2124_s30 = scalar_lea.hbm %s3374_s22, 2048  ;;  %s2128_s10 = scalar_lea.hbm %s3650_s18, 8192 }
 0x34b   : > { %p2125_p0 = scmp.ne.s32.totalorder %s3374_s22, %s2124_s30  ;;  %p2129_p4 = scmp.lt.u32.totalorder %s3374_s22, %s3650_s18 }
 0x34c   : > { %p2130_p1 = scmp.lt.u32.totalorder %s2128_s10, %s2124_s30  ;;  %p2132_p11 = scmp.lt.u32.totalorder %s2124_s30, %s3374_s22 }
 0x34d   : > { %p2126_p9 = pnand %p2125_p0, %p3651_p5 }
 0x34e   : > { %p2131_p2 = por %p2130_p1, %p2129_p4 }
 0x34f   : > { %p2127_p6 = pneg %p2126_p9 }
 0x350   : > { %p2133_p3 = por %p2132_p11, %p2131_p2 }
 0x352   : > { %p2134_p12 = pnand %p2133_p3, %p2127_p6 }
 0x354   : > { %2137 = shalt.err (!%p2134_p12)
}
 0x355   : > { %s2376_s24 = smov 128   ;;  %v1369_v59 = vmul.f32 %v1788_v44, %v1788_v44  ;;  %v1344_v28 = vadd.f32 %v1788_v44, %v1343_v51  ;;  %v1383_v35 = vadd.f32 %v1382_v56, %v1368_v57  ;;  %v1329_v4 = vld [vmem:[%s2790_s19] sm:$0xff]  ;;  %s1729_s20 = sshll.u32 %s3647_s2, 7  ;;  %v1353_v37 = vld [vmem:[%s2792_s9] sm:$0xff] }
 0x356   : > { %1820 = dma.vmem_to_hbm [thread:$0]  (%p3651_p5), %s3369_s6, 2048, %s3374_s22, %s1410_s25, %s2376_s24, %s2376_s24, %s2367_s8  }
 0x357   : > { %v1345_v62 = vrot.slane %v1344_v28, 4  ;;  %v1384_v13 = vadd.f32 %v1383_v35, %v1369_v59  ;;  %s1452_s8 = sshll.u32 %s2790_s19, 4  ;;  %s3652_s0 = sld [smem:[#allocation38_spill]]  ;;  %s3415_s8 = int_to_ptr.vmem [resolvable:$true] %s1452_s8 }
 0x358   : > { %s1465_s6 = sshll.u32 %s2792_s9, 4  ;;  %s3653_s11 = sld [smem:[#allocation45_spill]]  ;;  %s3423_s6 = int_to_ptr.vmem [resolvable:$true] %s1465_s6 }
 0x359   : > { %v1346_v29 = vadd.f32 %v1345_v62, %v1344_v28  ;;  %v1385_v48 = vrot.slane %v1384_v13, 4  ;;  %s3655_s30 = sld [smem:[#allocation46_spill]]  ;;  %s3427_s23 = scalar_lea.sflag [#allocation12], %s361_s4 }
 0x35a   : > { %s2138_s10 = scalar_lea.vmem %s3415_s8, 128  ;;  %s2377_s16 = smov [#allocation11]  }
 0x35b   : > { %v1347_v17 = vrot.slane %v1346_v29, 2  ;;  %v1386_v63 = vadd.f32 %v1385_v48, %v1384_v13  ;;  %p2139_p5 = scmp.ne.s32.totalorder %s3415_s8, %s2138_s10  ;;  %s2142_s24 = sshll.u32 %s2377_s16, 4  ;;  %s2143_s24 = int_to_ptr.vmem [resolvable:$false] %s2142_s24 }
 0x35c   : > { %p2145_p8 = scmp.lt.s32.totalorder %s3415_s8, %s2143_s24 }
 0x35d   : > { %v1348_v14 = vadd.f32 %v1347_v17, %v1346_v29  ;;  %v1387_v25 = vrot.slane %v1386_v63, 2  ;;  %p3657_p7 = scmp.ne.s32.totalorder %s3652_s0, 0 }
 0x35e   : > { %s3654_s1 = smov %s3653_s11  ;;  %s3413_s15 = scalar_lea.hbm %s3653_s11, %s1729_s20 }
 0x35f   : > { %v1388_v49 = vadd.f32 %v1387_v25, %v1386_v63  ;;  %v1349_v41 = vrot.slane %v1348_v14, 1  ;;  %s3656_s5 = smov %s3655_s30  ;;  %s3421_s27 = scalar_lea.hbm %s3655_s30, %s1729_s20 }
 0x360   : > { %p2140_p10 = pnand %p2139_p5, %p3657_p7 }
 0x361   : > { %v1350_v43 = vadd.f32 %v1349_v41, %v1348_v14  ;;  %v1389_v18 = vrot.slane %v1388_v49, 1 }
 0x362   : > { %p2141_p13 = pneg %p2140_p10 }
 0x363   : > { %v1351_v0 = vadd.f32 %v1350_v43, %v1329_v4  ;;  %v1390_v5 = vadd.f32 %v1389_v18, %v1388_v49 }
 0x365   : > { %1352 = vst [vmem:[%s2790_s19] sm:$0xff] %v1351_v0  ;;  %v1391_v52 = vadd.f32 %v1390_v5, %v1353_v37  ;;  %s2144_s19 = scalar_lea.vmem %s2143_s24, 256 }
 0x366   : > { %p2146_p0 = scmp.lt.s32.totalorder %s2144_s19, %s2138_s10 }
 0x368   : > { %p2147_p9 = por %p2146_p0, %p2145_p8 }
 0x36a   : > { %p2148_p6 = pnand %p2147_p9, %p2141_p13 }
 0x36c   : > { %2151 = shalt.err (!%p2148_p6)
}
 0x36d   : > { %s2152_s14 = scalar_lea.hbm %s3413_s15, 128  ;;  %s2156_s22 = scalar_lea.hbm %s3654_s1, 256 }
 0x36e   : > { %p2153_p4 = scmp.ne.s32.totalorder %s3413_s15, %s2152_s14  ;;  %p2157_p11 = scmp.lt.u32.totalorder %s3413_s15, %s3654_s1 }
 0x36f   : > { %p2158_p3 = scmp.lt.u32.totalorder %s2156_s22, %s2152_s14  ;;  %p2160_p5 = scmp.lt.u32.totalorder %s2152_s14, %s3413_s15 }
 0x370   : > { %p2154_p1 = pnand %p2153_p4, %p3657_p7 }
 0x371   : > { %p2159_p12 = por %p2158_p3, %p2157_p11 }
 0x372   : > { %p2155_p2 = pneg %p2154_p1 }
 0x373   : > { %p2161_p10 = por %p2160_p5, %p2159_p12 }
 0x375   : > { %p2162_p13 = pnand %p2161_p10, %p2155_p2 }
 0x377   : > { %2165 = shalt.err (!%p2162_p13)
}
 0x378   : > { %1821 = dma.vmem_to_hbm [thread:$0]  (%p3657_p7), %s3415_s8, 128, %s3413_s15, %s3427_s23   ;;  %1392 = vst [vmem:[%s2792_s9] sm:$0xff] %v1391_v52 }
 0x379   : > { %s2166_s2 = scalar_lea.vmem %s3423_s6, 128  ;;  %s2378_s21 = smov [#allocation13]  }
 0x37a   : > { %p2167_p8 = scmp.ne.s32.totalorder %s3423_s6, %s2166_s2  ;;  %s2170_s30 = sshll.u32 %s2378_s21, 4  ;;  %s2171_s30 = int_to_ptr.vmem [resolvable:$false] %s2170_s30 }
 0x37b   : > { %s2172_s10 = scalar_lea.vmem %s2171_s30, 256  ;;  %p2173_p6 = scmp.lt.s32.totalorder %s3423_s6, %s2171_s30 }
 0x37c   : > { %p2168_p0 = pnand %p2167_p8, %p3657_p7  ;;  %p2174_p4 = scmp.lt.s32.totalorder %s2172_s10, %s2166_s2 }
 0x37e   : > { %p2169_p9 = pneg %p2168_p0  ;;  %p2175_p1 = por %p2174_p4, %p2173_p6 }
 0x380   : > { %p2176_p2 = pnand %p2175_p1, %p2169_p9 }
 0x382   : > { %2179 = shalt.err (!%p2176_p2)
}
 0x383   : > { %s2180_s9 = scalar_lea.hbm %s3421_s27, 128  ;;  %s2184_s16 = scalar_lea.hbm %s3656_s5, 256 }
 0x384   : > { %p2181_p11 = scmp.ne.s32.totalorder %s3421_s27, %s2180_s9  ;;  %p2185_p5 = scmp.lt.u32.totalorder %s3421_s27, %s3656_s5 }
 0x385   : > { %p2186_p10 = scmp.lt.u32.totalorder %s2184_s16, %s2180_s9  ;;  %p2188_p8 = scmp.lt.u32.totalorder %s2180_s9, %s3421_s27 }
 0x386   : > { %p2182_p3 = pnand %p2181_p11, %p3657_p7 }
 0x387   : > { %p2187_p13 = por %p2186_p10, %p2185_p5 }
 0x388   : > { %p2183_p12 = pneg %p2182_p3 }
 0x389   : > { %p2189_p0 = por %p2188_p8, %p2187_p13 }
 0x38b   : > { %p2190_p9 = pnand %p2189_p0, %p2183_p12 }
 0x38d   : > { %2193 = shalt.err (!%p2190_p9)
}
 0x38e   : > { %1822 = dma.vmem_to_hbm [thread:$0]  (%p3657_p7), %s3423_s6, 128, %s3421_s27, %s3427_s23  }
 0x38f PF: > { %s3658_s14 = sld [smem:[#allocation23_spill]]  ;;  %s3659_s4 = sld [smem:[#allocation36_spill]] }
 0x390   : > { %p1842_p6 = scmp.ge.s32.totalorder %s2354_s13, 2 }
 0x395   : > { %s1477_s20 = sand.u32 1, %s3658_s14   ;;  %p3660_p4 = scmp.ne.s32.totalorder %s3659_s4, 0 }
 0x396   : > { %s1478_s22 = scalar_lea.sflag [#allocation4], %s1477_s20 }
 0x397   : > { %p1831_p1 = pnand %p1842_p6, %p3660_p4 }
 0x399   : > { %2279 = dma.done.wait (!%p1831_p1), %s1478_s22, 2048  }
 0x39a   : > { %2281 = vsyncadd (!%p1831_p1), %s1478_s22, 4294965248  ;;  %s3661_s25 = sadd.s32 4294967294, %s2354_s13   ;;  %s3662_s11 = sld [smem:[#allocation39_spill]] }
 0x39b   : > { %s1486_s2 = sand.u32 1, %s3661_s25  }
 0x39c   : > { %s1487_s0 = scalar_lea.sflag [#allocation12], %s1486_s2 }
 0x3a0   : > { %p3663_p2 = scmp.ne.s32.totalorder %s3662_s11, 0 }
 0x3a2   : > { %p1834_p11 = pnand %p1842_p6, %p3663_p2 }
 0x3a4   : > { %2283 = dma.done.wait (!%p1834_p11), %s1487_s0, 256  }
 0x3a5   : > { %2285 = vsyncadd (!%p1834_p11), %s1487_s0, 4294967040  ;;  %s30_s13 = sadd.s32 1, %s2354_s13   ;;  %s3665_s21 = sld [smem:[#allocation20_spill]] }
 0x3a6   : > { %p3483_p7 = scmp.ge.s32.totalorder %s30_s13, 6   ;;  %s3666_s22 = sld [smem:[#allocation21_spill]] }
 0x3a7   : > { %s3667_s23 = sld [smem:[#allocation37_spill]]  ;;  %s3669_s27 = sld [smem:[#allocation34_spill]] }
 0x3a8   : > { %s3668_s24 = sld [smem:[#allocation22_spill]]  ;;  %s3670_s30 = sld [smem:[#allocation32_spill]] }
 0x3a9   : > { %s3671_s10 = sld [smem:[#allocation24_spill]]  ;;  %s3672_s8 = sld [smem:[#allocation31_spill]] }
 0x3aa   : > { %s3673_s9 = sld [smem:[#allocation27_spill]]  ;;  %s3674_s11 = sld [smem:[#allocation28_spill]] }
 0x3ab   : > { %s3675_s15 = sld [smem:[#allocation29_spill]]  ;;  %s3676_s25 = smov %s2310_s26 }
 0x3ac   :  { %29 = sbr.rel (!%p3483_p7) target bundleno = 25 (0x19), region = 145 }
 0x3ad   : > { %s3677_s26 = smov %s3669_s27  ;;  %s3678_s27 = smov %s2318_s28 }
 0x3ae   : > { %s3679_s28 = smov %s2322_s29  ;;  %s3680_s29 = smov %s3670_s30 }
 0x3af   : > { %s3681_s30 = smov %s2330_s7  ;;  %s3682_s7 = smov %s3671_s10 }
 0x3b0   : > { %s3683_s10 = smov %s2350_s12 }
 0x3b1   : > { %s3684_s12 = smov %s3675_s15 }
 0x3b3   :  { %1501 = vsyncpa [#allocation3], 1 }
 0x3b4   :  { %1503 = vsyncpa [#allocation3 + $0x1], 1 }
 0x3b5   :  { %1504 = vsyncpa [#allocation6], 1 }
 0x3b6   :  { %1506 = vsyncpa [#allocation6 + $0x1], 1 }
 0x3b7   :  { %1507 = vsyncpa [#allocation9], 1 }
 0x3b8   :  { %1508 = vsyncpa [#allocation4], 1 }
 0x3b9   :  { %1510 = vsyncpa [#allocation4 + $0x1], 1 }
 0x3ba   :  { %1511 = vsyncpa [#allocation12], 1 }
 0x3bb   :  { %1513 = vsyncpa [#allocation12 + $0x1], 1 }

</bundles_post_ra>
